<compile_context>
chip_gen: v5e
topology: v5e:2x2
jax: 0.10.0
libtpu: 0.0.40
codegen_flags: <defaults>
</compile_context>

<pallas_src>
import math
import numpy as np
import jax
import jax.numpy as jnp
from jax import lax
from jax.experimental import pallas as pl
from jax.experimental.pallas import tpu as pltpu


_C1 = (0.01 * 255) ** 2
_C2 = (0.03 * 255) ** 2
_MXU_TILE = 256  # v6e/v7x MXU dimension; 128-aligned so it also tiles cleanly on v5e.


def _gaussian_1d(size):
    """Same 1D Gaussian as SSIMLoss.create_window."""
    g = np.array(
        [math.exp(-((x - size // 2) ** 2) / float(2 * 1.5 ** 2)) for x in range(size)],
        dtype=np.float64,
    )
    return (g / g.sum()).astype(np.float32)


def _band_matrix(n, g):
    """Banded matrix B with (B @ x) == 1-D 'same' conv of x with zero padding."""
    size = g.shape[0]
    p = size // 2
    m = np.zeros((n, n), np.float32)
    for i in range(n):
        for k in range(size):
            r = i + k - p
            if 0 <= r < n:
                m[i, r] = g[k]
    return m


def _ssim_kernel(bh_ref, bw_ref, x1_ref, x2_ref, out_ref):
    bh = bh_ref[...]                        # (bH, bH) block-diag banded Gaussian (row pass)
    bw = bw_ref[...]                        # (W, W)   banded Gaussian (col pass), shared
    x1 = x1_ref[...].astype(jnp.float32)    # (bH, W)  b images stacked along sublanes
    x2 = x2_ref[...].astype(jnp.float32)

    def dot(a, b):
        # Mosaic only lowers DEFAULT/HIGHEST; DEFAULT (1-pass bf16) breaks the
        # sigma cancellation, so keep HIGHEST (see header note on Precision.HIGH).
        return jnp.dot(a, b, preferred_element_type=jnp.float32,
                       precision=lax.Precision.HIGHEST)

    # Elementwise products first (VPU), then all five row-passes back-to-back
    # (bh stationary on the MXU), then all five column-passes back-to-back.
    terms = (x1, x2, x1 * x1, x2 * x2, x1 * x2)
    t = [dot(bh, m) for m in terms]                         # 5x (bH, W)
    mu1, mu2, e11, e22, e12 = [dot(ti, bw) for ti in t]     # 5x (bH, W)

    mu1_sq = mu1 * mu1
    mu2_sq = mu2 * mu2
    mu1_mu2 = mu1 * mu2
    sigma1_sq = e11 - mu1_sq
    sigma2_sq = e22 - mu2_sq
    sigma12 = e12 - mu1_mu2

    num = (2.0 * mu1_mu2 + _C1) * (2.0 * sigma12 + _C2)
    den = (mu1_sq + mu2_sq + _C1) * (sigma1_sq + sigma2_sq + _C2)
    # approx=True (~2^-12 rel err) is too close to the validation tolerance
    # once averaged into 1 - mean(ssim); keep the exact reciprocal.
    ssim = num * pl.reciprocal(den, approx=False)

    # One partial sum per grid step, splatted into a lane-dense (8,128) block
    # (unmasked vst; disjoint per step so the grid axis stays "parallel").
    out_ref[...] = jnp.full(out_ref.shape, jnp.sum(ssim), dtype=jnp.float32)


def _vmem_capacity_bytes():
    try:
        return int(pltpu.get_tpu_info().vmem_capacity_bytes)
    except Exception:
        return 64 * 1024 * 1024  # conservative default (v7x per-core VMEM)


def _pick_images_per_step(NC, H, W, vmem_budget, mxu_tile=_MXU_TILE):
    """Images stacked along sublanes per grid step.

    Constraints: b divides NC; the (b*H, W) block is (8,128)-legal; the
    block-diag kron(I_b, B_H) stays within one MXU tile; live VMEM (including
    the 2x pipeline buffers of both streamed inputs and the band matrices)
    fits the budget.  Prefers >= 2 grid steps so the "parallel" axis can split
    across the two TensorCores of a v7x chip.
    """
    lanes = max(W, 128)  # vregs / VMEM pad the lane axis to 128

    def live_bytes(b):
        rows = b * H
        slab = rows * lanes * 4
        band = 4 * (rows * rows + W * max(W, 128))
        # 2 streamed inputs x 2 pipeline buffers, 2x (tiny) band matrices,
        # ~10 live f32 slabs inside the body (inputs, products, 5 conv outs).
        return 2 * 2 * slab + 2 * band + 10 * slab

    cands = [
        b for b in range(1, NC + 1)
        if NC % b == 0
        and (b == NC or (b * H) % 8 == 0)
        and b * H <= mxu_tile
        and live_bytes(b) <= vmem_budget
    ]
    if not cands:
        # Never silently blow the budget by returning NC; fall back to one
        # image per step.  Large single images still use a dense (H,H) band.
        # TODO(synk): block-banded (halo) tiling of B_H / B_W for H, W >~ 512
        # so only the ~11-wide diagonal band of tiles is multiplied.
        return 1
    multi = [b for b in cands if NC // b >= 2]
    return max(multi) if multi else max(cands)


def ssim_loss_pallas(img1, img2, size=11, channel=3):
    """Pallas equivalent of SSIMLoss(size, channel)(img1, img2)."""
    N, C, H, W = img1.shape
    assert C == channel, "channel mismatch with module config"
    NC = N * C

    # Generation-aware VMEM limit: ~48 MiB on v7x (64 MiB/TC), 96 MiB on v5e/v6e.
    vmem_cap = _vmem_capacity_bytes()
    vmem_limit = min(96 * 1024 * 1024,
                     max(vmem_cap - 16 * 1024 * 1024, 32 * 1024 * 1024))

    b_imgs = _pick_images_per_step(NC, H, W, vmem_budget=vmem_limit // 2)
    G = NC // b_imgs
    bH = b_imgs * H

    g = _gaussian_1d(size)
    # Block-diagonal row-pass matrix (<= one MXU tile) and shared col-pass matrix.
    bh = jnp.asarray(np.kron(np.eye(b_imgs, dtype=np.float32), _band_matrix(H, g)))
    bw = jnp.asarray(_band_matrix(W, g).T)   # symmetric for odd windows; .T for clarity

    # Free, contiguous reshape (no transpose, no extra HBM traffic):
    # image i occupies sublane rows [i*H, (i+1)*H).
    x1 = img1.reshape(NC * H, W)
    x2 = img2.reshape(NC * H, W)

    out = pl.pallas_call(
        _ssim_kernel,
        out_shape=jax.ShapeDtypeStruct((G, 8, 128), jnp.float32),
        grid=(G,),
        in_specs=[
            # Constant index_maps -> fetched once, not re-DMA'd per step; a few
            # KB each, so default double-buffering is free (pl.Buffered(1) not
            # needed after the kron(I, B_W) removal).
            pl.BlockSpec((bH, bH), lambda gi: (0, 0)),   # block-diag B_H
            pl.BlockSpec((W, W), lambda gi: (0, 0)),     # B_W
            pl.BlockSpec((bH, W), lambda gi: (gi, 0)),   # img1 chunk (b_imgs images)
            pl.BlockSpec((bH, W), lambda gi: (gi, 0)),   # img2 chunk
        ],
        out_specs=pl.BlockSpec((1, 8, 128), lambda gi: (gi, 0, 0)),
        compiler_params=pltpu.CompilerParams(
            dimension_semantics=("parallel",),
            vmem_limit_bytes=vmem_limit,
        ),
    )(bh, bw, x1, x2)

    partial_sums = out[:, 0, 0]              # contiguous: one partial sum per step
    return 1.0 - jnp.sum(partial_sums) / (N * C * H * W)


def ssim_loss_ref(img1, img2, size=11, channel=3):
    """Pure-JAX reference mirroring the PyTorch module (for validation)."""
    g = jnp.array(
        [math.exp(-((x - size // 2) ** 2) / float(2 * 1.5 ** 2)) for x in range(size)],
        jnp.float32,
    )
    g = g / jnp.sum(g)
    w2d = jnp.outer(g, g)
    window = jnp.broadcast_to(w2d[None, None], (channel, 1, size, size))
    pad = size // 2

    def conv(x):
        return lax.conv_general_dilated(
            x, window, (1, 1), [(pad, pad), (pad, pad)],
            dimension_numbers=("NCHW", "OIHW", "NCHW"),
            feature_group_count=channel,
            precision=lax.Precision.HIGHEST,
        )

    mu1 = conv(img1)
    mu2 = conv(img2)
    mu1_sq = mu1 * mu1
    mu2_sq = mu2 * mu2
    mu1_mu2 = mu1 * mu2
    sigma1_sq = conv(img1 * img1) - mu1_sq
    sigma2_sq = conv(img2 * img2) - mu2_sq
    sigma12 = conv(img1 * img2) - mu1_mu2
    ssim_map = (2 * mu1_mu2 + _C1) * (2 * sigma12 + _C2) / (
        (mu1_sq + mu2_sq + _C1) * (sigma1_sq + sigma2_sq + _C2)
    )
    return 1.0 - jnp.mean(ssim_map)


if __name__ == "__main__":
    key = jax.random.PRNGKey(0)
    k1, k2 = jax.random.split(key)
    # Small shapes consistent with the module's example: N=2, C=3, 16x16.
    img1 = jax.random.uniform(k1, (2, 3, 16, 16), dtype=jnp.float32)
    img2 = jax.random.uniform(k2, (2, 3, 16, 16), dtype=jnp.float32)

    loss = jax.block_until_ready(ssim_loss_pallas(img1, img2, size=11, channel=3))
    ref = jax.block_until_ready(ssim_loss_ref(img1, img2, size=11, channel=3))
    assert abs(float(loss) - float(ref)) < 2e-4, (float(loss), float(ref))

    print("KERNEL_OK")
</pallas_src>

<mosaic_0001>
module attributes {stable_mosaic.version = 11 : i64} {
  func.func @_ssim_kernel(%arg0: i32, %arg1: memref<48x48xf32, #tpu.memory_space<vmem>>, %arg2: memref<16x16xf32, #tpu.memory_space<vmem>>, %arg3: memref<48x16xf32, #tpu.memory_space<vmem>>, %arg4: memref<48x16xf32, #tpu.memory_space<vmem>>, %arg5: memref<1x8x128xf32, #tpu.memory_space<vmem>>) attributes {dimension_semantics = [#tpu.dimension_semantics<parallel>], iteration_bounds = array<i64: 2>, scalar_prefetch = 0 : i64, scratch_operands = 0 : i64, tpu.core_type = #tpu.core_type<tc>, window_params = [{pipeline_mode = #tpu.pipeline_mode<synchronous>, transform_indices = @transform_0, window_bounds = array<i64: 48, 48>}, {pipeline_mode = #tpu.pipeline_mode<synchronous>, transform_indices = @transform_1, window_bounds = array<i64: 16, 16>}, {transform_indices = @transform_2, window_bounds = array<i64: 48, 16>}, {transform_indices = @transform_3, window_bounds = array<i64: 48, 16>}, {transform_indices = @transform_4, window_bounds = array<i64: 1, 8, 128>}]} {
    %c0 = arith.constant 0 : index
    %c0_0 = arith.constant 0 : index
    %0 = vector.load %arg1[%c0, %c0_0] : memref<48x48xf32, #tpu.memory_space<vmem>>, vector<48x48xf32>
    %c0_1 = arith.constant 0 : index
    %c0_2 = arith.constant 0 : index
    %1 = vector.load %arg2[%c0_1, %c0_2] : memref<16x16xf32, #tpu.memory_space<vmem>>, vector<16x16xf32>
    %c0_3 = arith.constant 0 : index
    %c0_4 = arith.constant 0 : index
    %2 = vector.load %arg3[%c0_3, %c0_4] : memref<48x16xf32, #tpu.memory_space<vmem>>, vector<48x16xf32>
    %c0_5 = arith.constant 0 : index
    %c0_6 = arith.constant 0 : index
    %3 = vector.load %arg4[%c0_5, %c0_6] : memref<48x16xf32, #tpu.memory_space<vmem>>, vector<48x16xf32>
    %4 = arith.mulf %2, %2 : vector<48x16xf32>
    %5 = arith.mulf %3, %3 : vector<48x16xf32>
    %6 = arith.mulf %2, %3 : vector<48x16xf32>
    %cst = arith.constant dense<0.000000e+00> : vector<48x16xf32>
    %7 = tpu.matmul %0, %2, %cst {dimension_numbers = #tpu.dot_dimension_numbers<[1], [0], [0], [1], [0, 0, 1, 1], [], []>, precision = #tpu.contract_precision<fp32>} : vector<48x48xf32>, vector<48x16xf32>, vector<48x16xf32> -> vector<48x16xf32>
    %cst_7 = arith.constant dense<0.000000e+00> : vector<48x16xf32>
    %8 = tpu.matmul %0, %3, %cst_7 {dimension_numbers = #tpu.dot_dimension_numbers<[1], [0], [0], [1], [0, 0, 1, 1], [], []>, precision = #tpu.contract_precision<fp32>} : vector<48x48xf32>, vector<48x16xf32>, vector<48x16xf32> -> vector<48x16xf32>
    %cst_8 = arith.constant dense<0.000000e+00> : vector<48x16xf32>
    %9 = tpu.matmul %0, %4, %cst_8 {dimension_numbers = #tpu.dot_dimension_numbers<[1], [0], [0], [1], [0, 0, 1, 1], [], []>, precision = #tpu.contract_precision<fp32>} : vector<48x48xf32>, vector<48x16xf32>, vector<48x16xf32> -> vector<48x16xf32>
    %cst_9 = arith.constant dense<0.000000e+00> : vector<48x16xf32>
    %10 = tpu.matmul %0, %5, %cst_9 {dimension_numbers = #tpu.dot_dimension_numbers<[1], [0], [0], [1], [0, 0, 1, 1], [], []>, precision = #tpu.contract_precision<fp32>} : vector<48x48xf32>, vector<48x16xf32>, vector<48x16xf32> -> vector<48x16xf32>
    %cst_10 = arith.constant dense<0.000000e+00> : vector<48x16xf32>
    %11 = tpu.matmul %0, %6, %cst_10 {dimension_numbers = #tpu.dot_dimension_numbers<[1], [0], [0], [1], [0, 0, 1, 1], [], []>, precision = #tpu.contract_precision<fp32>} : vector<48x48xf32>, vector<48x16xf32>, vector<48x16xf32> -> vector<48x16xf32>
    %cst_11 = arith.constant dense<0.000000e+00> : vector<48x16xf32>
    %12 = tpu.matmul %7, %1, %cst_11 {dimension_numbers = #tpu.dot_dimension_numbers<[1], [0], [0], [1], [0, 0, 1, 1], [], []>, precision = #tpu.contract_precision<fp32>} : vector<48x16xf32>, vector<16x16xf32>, vector<48x16xf32> -> vector<48x16xf32>
    %cst_12 = arith.constant dense<0.000000e+00> : vector<48x16xf32>
    %13 = tpu.matmul %8, %1, %cst_12 {dimension_numbers = #tpu.dot_dimension_numbers<[1], [0], [0], [1], [0, 0, 1, 1], [], []>, precision = #tpu.contract_precision<fp32>} : vector<48x16xf32>, vector<16x16xf32>, vector<48x16xf32> -> vector<48x16xf32>
    %cst_13 = arith.constant dense<0.000000e+00> : vector<48x16xf32>
    %14 = tpu.matmul %9, %1, %cst_13 {dimension_numbers = #tpu.dot_dimension_numbers<[1], [0], [0], [1], [0, 0, 1, 1], [], []>, precision = #tpu.contract_precision<fp32>} : vector<48x16xf32>, vector<16x16xf32>, vector<48x16xf32> -> vector<48x16xf32>
    %cst_14 = arith.constant dense<0.000000e+00> : vector<48x16xf32>
    %15 = tpu.matmul %10, %1, %cst_14 {dimension_numbers = #tpu.dot_dimension_numbers<[1], [0], [0], [1], [0, 0, 1, 1], [], []>, precision = #tpu.contract_precision<fp32>} : vector<48x16xf32>, vector<16x16xf32>, vector<48x16xf32> -> vector<48x16xf32>
    %cst_15 = arith.constant dense<0.000000e+00> : vector<48x16xf32>
    %16 = tpu.matmul %11, %1, %cst_15 {dimension_numbers = #tpu.dot_dimension_numbers<[1], [0], [0], [1], [0, 0, 1, 1], [], []>, precision = #tpu.contract_precision<fp32>} : vector<48x16xf32>, vector<16x16xf32>, vector<48x16xf32> -> vector<48x16xf32>
    %17 = arith.mulf %12, %12 : vector<48x16xf32>
    %18 = arith.mulf %13, %13 : vector<48x16xf32>
    %19 = arith.mulf %12, %13 : vector<48x16xf32>
    %20 = arith.subf %14, %17 : vector<48x16xf32>
    %21 = arith.subf %15, %18 : vector<48x16xf32>
    %22 = arith.subf %16, %19 : vector<48x16xf32>
    %cst_16 = arith.constant 2.000000e+00 : f32
    %23 = vector.broadcast %cst_16 : f32 to vector<48x16xf32>
    %24 = arith.mulf %23, %19 : vector<48x16xf32>
    %cst_17 = arith.constant 6.502500e+00 : f32
    %25 = vector.broadcast %cst_17 : f32 to vector<48x16xf32>
    %26 = arith.addf %24, %25 : vector<48x16xf32>
    %cst_18 = arith.constant 2.000000e+00 : f32
    %27 = vector.broadcast %cst_18 : f32 to vector<48x16xf32>
    %28 = arith.mulf %27, %22 : vector<48x16xf32>
    %cst_19 = arith.constant 5.852250e+01 : f32
    %29 = vector.broadcast %cst_19 : f32 to vector<48x16xf32>
    %30 = arith.addf %28, %29 : vector<48x16xf32>
    %31 = arith.mulf %26, %30 : vector<48x16xf32>
    %32 = arith.addf %17, %18 : vector<48x16xf32>
    %cst_20 = arith.constant 6.502500e+00 : f32
    %33 = vector.broadcast %cst_20 : f32 to vector<48x16xf32>
    %34 = arith.addf %32, %33 : vector<48x16xf32>
    %35 = arith.addf %20, %21 : vector<48x16xf32>
    %cst_21 = arith.constant 5.852250e+01 : f32
    %36 = vector.broadcast %cst_21 : f32 to vector<48x16xf32>
    %37 = arith.addf %35, %36 : vector<48x16xf32>
    %38 = arith.mulf %34, %37 : vector<48x16xf32>
    %39 = tpu.reciprocal %38 : vector<48x16xf32> -> vector<48x16xf32>
    %40 = arith.mulf %31, %39 : vector<48x16xf32>
    %41 = vector.shape_cast %40 : vector<48x16xf32> to vector<1x48x16xf32>
    %cst_22 = arith.constant dense<0.000000e+00> : vector<1xf32>
    %42 = vector.multi_reduction <add>, %41, %cst_22 [1, 2] : vector<1x48x16xf32> to vector<1xf32>
    %43 = vector.shape_cast %42 : vector<1xf32> to vector<1x1x1xf32>
    %44 = vector.extract %43[0, 0, 0] : f32 from vector<1x1x1xf32>
    %45 = vector.broadcast %44 : f32 to vector<1x8x128xf32>
    %c0_23 = arith.constant 0 : index
    %c0_24 = arith.constant 0 : index
    %c0_25 = arith.constant 0 : index
    %46 = vector.load %arg5[%c0_23, %c0_24, %c0_25] : memref<1x8x128xf32, #tpu.memory_space<vmem>>, vector<1x8x128xf32>
    tpu.vector_store %arg5[%c0_23, %c0_24, %c0_25], %45 {strides = array<i32>} : memref<1x8x128xf32, #tpu.memory_space<vmem>>, vector<1x8x128xf32>,
    return
  }
  func.func @transform_0(%arg0: i32) -> (i32, i32) {
    %c0_i32 = arith.constant 0 : i32
    %c0_i32_0 = arith.constant 0 : i32
    %c0_i32_1 = arith.constant 0 : i32
    return %c0_i32, %c0_i32_0 : i32, i32
  }
  func.func @transform_1(%arg0: i32) -> (i32, i32) {
    %c0_i32 = arith.constant 0 : i32
    %c0_i32_0 = arith.constant 0 : i32
    %c0_i32_1 = arith.constant 0 : i32
    return %c0_i32, %c0_i32_0 : i32, i32
  }
  func.func @transform_2(%arg0: i32) -> (i32, i32) {
    %c0_i32 = arith.constant 0 : i32
    %c0_i32_0 = arith.constant 0 : i32
    return %arg0, %c0_i32 : i32, i32
  }
  func.func @transform_3(%arg0: i32) -> (i32, i32) {
    %c0_i32 = arith.constant 0 : i32
    %c0_i32_0 = arith.constant 0 : i32
    return %arg0, %c0_i32 : i32, i32
  }
  func.func @transform_4(%arg0: i32) -> (i32, i32, i32) {
    %c0_i32 = arith.constant 0 : i32
    %c0_i32_0 = arith.constant 0 : i32
    %c0_i32_1 = arith.constant 0 : i32
    return %arg0, %c0_i32, %c0_i32_0 : i32, i32, i32
  }
}

</mosaic_0001>

<bundles_post_ra>
// kernel: tpu_custom_call.1
= control target key start
LH: loop header
LB: loop body
LE: loop exit
PB: predicated region body
PF: predicated region fallthrough
CT: control target
= control target key end

     0   :  { %9 = vsyncpa [#allocation3], 0  ;;  %s6070_s0 = inlined_call_operand.vmem [shape: f32[48,48], index: 0, kind: input, shape index: {}]   ;;  %s6071_s1 = inlined_call_operand.vmem [shape: f32[16,16], index: 1, kind: input, shape index: {}]   ;;  %s6072_s2 = inlined_call_operand.vmem [shape: f32[96,16], index: 2, kind: input, shape index: {}]   ;;  %s6073_s3 = inlined_call_operand.vmem [shape: f32[96,16], index: 3, kind: input, shape index: {}]   ;;  %s6074_s4 = inlined_call_operand.hbm [shape: f32[2,8,128], index: 4, kind: output, shape index: {}]  }
   0x1   :  { %11 = vsyncpa [#allocation3 + $0x1], 0  ;;  %s4221_s15 = smov 0   ;;  %s4223_s16 = smov 0  }
   0x2   :  { %s4225_s17 = smov 0   ;;  %s4227_s18 = smov 0  }
   0x3 LB: > { %s4242_s19 = sadd.s32 4294967295, %s4194_s18   ;;  %s4063_s20 = sadd.s32 4294967294, %s4194_s18   ;;  %s4194_s18 = sphi %s4227_s18, %s6136_s18   ;;  %s4190_s17 = sphi %s4225_s17, %s6135_s17   ;;  %s4186_s16 = sphi %s4223_s16, %s6134_s16   ;;  %s4182_s15 = sphi %s4221_s15, %s6133_s15  }
   0x4   : > { %s4246_s21 = sadd.s32 1, %s4194_s18   ;;  %s118_s22 = sadd.s32 1, %s4190_s17 }
   0x5   : > { %s115_s23 = ssub.s32 %s4194_s18, %s4246_s21  ;;  %p128_p0 = scmp.ne.s32.totalorder %s4190_s17, %s4186_s16 }
   0x6   : > { %p116_p1 = scmp.eq.s32.totalorder %s115_s23, 0  ;;  %p129_p2 = scmp.eq.s32.totalorder %s4242_s19, 1 }
   0x7   : > { %p134_p3 = scmp.ne.s32.totalorder %s4186_s16, %s4182_s15  ;;  %p135_p4 = scmp.eq.s32.totalorder %s4063_s20, 1 }
   0x8   : > { %s4257_s24 = scalar_select %p116_p1, %s4190_s17, %s118_s22  }
   0x9   : > { %p4259_p5 = por %p129_p2, %p128_p0  ;;  %p4263_p6 = por %p135_p4, %p134_p3 }
   0xa   : > { %p4066_p7 = scmp.ge.s32.totalorder %s4194_s18, 1  ;;  %p177_p8 = scmp.lt.s32.totalorder %s4194_s18, 3 }
   0xc   : > { %p178_p9 = pnand %p4066_p7, %p177_p8 }
   0xe   : > { %181 = sbr.rel (%p178_p9) target bundleno = 1088 (0x440), region = 36 }
  0x13   : > { %s208_s27 = smul.u32 6, %s4242_s19  ;;  %v220_v0 = vld [vmem:[%s6070_s0] sm:$0xff]  ;;  %vm258_vm0 = vcmask 392192   ;;  %v221_v3 = vld [vmem:[%s6070_s0 + $0x8] sm:$0xff]  ;;  %v222_v6 = vld [vmem:[%s6070_s0 + $0x10] sm:$0xff]  ;;  %vm2107_vm1 = vcmask 130048  }
  0x14   : > { %v260_v1 = vsel %vm258_vm0, %v220_v0, 0  ;;  %v263_v4 = vsel %vm258_vm0, %v221_v3, 0  ;;  %v266_v29 = vsel %vm258_vm0, %v222_v6, 0  ;;  %v223_v62 = vld [vmem:[%s6070_s0 + $0x18] sm:$0xff]  ;;  %s205_s8 = sand.u32 1, %s4186_s16   ;;  %s4071_s10 = sshll.u32 %s4242_s19, 3 }
  0x15   : > { %p209_p10 = scmp.lt.s32.totalorder %s208_s27, 11  ;;  %v4274_v2 = vand.u32 4294901760, %v260_v1  ;;  %v4305_v10 = vand.u32 4294901760, %v263_v4  ;;  %v4422_v52 = vand.u32 4294901760, %v266_v29  ;;  %s3987_s13 = scalar_lea.hbm %s6074_s4, %s4071_s10 }
  0x16   : > { %s3991_s22 = sshll.u32 %s3987_s13, 4  ;;  %s4152_s5 = scalar_lea.hbm %s6074_s4, 16  ;;  %s3992_s22 = int_to_ptr.hbm [resolvable:$true] %s3991_s22 }
  0x17   : > { %s6138_s27 = smov (!%p209_p10, %s208_s27), 11  ;;  %v4281_v5 = vsub.f32 %v260_v1, %v4274_v2  ;;  %v4385_v36 = vsub.f32 %v263_v4, %v4305_v10  ;;  %v4469_v6 = vsub.f32 %v266_v29, %v4422_v52  ;;  %s4146_s28 = sshra.s32 %s3992_s22, 4  ;;  %s4147_s28 = int_to_ptr.hbm [resolvable:$true] %s4146_s28 }
  0x18   : > { %s4068_s6 = sshll.u32 %s6138_s27, 3  ;;  %s3977_s27 = scalar_lea.sflag [#allocation3], %s205_s8 }
  0x19   : > { %s4286_s9 = scalar_lea.vmem %s6072_s2, %s4068_s6  ;;  %s4291_s12 = scalar_lea.vmem %s6073_s3, %s4068_s6  ;;  %v4335_v20 = vand.u32 4294901760, %v4281_v5  ;;  %v4431_v55 = vand.u32 4294901760, %v4385_v36 }
  0x1a   : > { %v4297_v7 = vld [vmem:[%s4286_s9 + $0x28] sm:$0xff]  ;;  %v4300_v8 = vld [vmem:[%s4286_s9 + $0x20] sm:$0xff]  ;;  %v4303_v9 = vld [vmem:[%s4286_s9 + $0x18] sm:$0xff]  ;;  %s4148_s29 = scalar_lea.hbm %s4147_s28, 8  ;;  %p4153_p0 = scmp.lt.s32.totalorder %s4147_s28, %s6074_s4 }
  0x1b   : > { %v4308_v11 = vand.u32 4294901760, %v4297_v7  ;;  %v4311_v12 = vand.u32 4294901760, %v4300_v8  ;;  %v4314_v13 = vand.u32 4294901760, %v4303_v9  ;;  %v4317_v14 = vld [vmem:[%s4286_s9 + $0x10] sm:$0xff]  ;;  %v4320_v15 = vld [vmem:[%s4286_s9 + $0x8] sm:$0xff]  ;;  %v4323_v16 = vld [vmem:[%s4286_s9] sm:$0xff]  ;;  %v302_v40 = vsub.f32 %v4281_v5, %v4335_v20  ;;  %p4149_p11 = scmp.ne.s32.totalorder %s4147_s28, %s4148_s29  ;;  %p4154_p1 = scmp.lt.s32.totalorder %s4152_s5, %s4148_s29 }
  0x1c   : > { %v4326_v17 = vand.u32 4294901760, %v4317_v14  ;;  %v4329_v18 = vand.u32 4294901760, %v4320_v15  ;;  %v4332_v19 = vand.u32 4294901760, %v4323_v16  ;;  %v4338_v21 = vld [vmem:[%s4291_s12 + $0x28] sm:$0xff]  ;;  %v4358_v26 = vld [vmem:[%s4291_s12 + $0x20] sm:$0xff]  ;;  %v4409_v45 = vld [vmem:[%s4291_s12 + $0x18] sm:$0xff]  ;;  %v310_v4 = vsub.f32 %v4385_v36, %v4431_v55 }
  0x1d   : > { %288 = vmatpush.msra.mxu0 %v4308_v11  ;;  %489 = vmatpush.msra.mxu3 %v4308_v11  ;;  %v4344_v22 = vsub.f32 %v4297_v7, %v4308_v11  ;;  %v4348_v23 = vsub.f32 %v4300_v8, %v4311_v12  ;;  %v4352_v24 = vsub.f32 %v4303_v9, %v4314_v13  ;;  %v4355_v25 = vand.u32 4294901760, %v4338_v21  ;;  %v4414_v48 = vld [vmem:[%s4291_s12 + $0x10] sm:$0xff]  ;;  %p4150_p12 = pnand %p4149_p11, %p4259_p5  ;;  %p4155_p2 = por %p4154_p1, %p4153_p0 }
  0x1e   : > { %v4362_v27 = vsub.f32 %v4317_v14, %v4326_v17  ;;  %v4366_v28 = vsub.f32 %v4320_v15, %v4329_v18  ;;  %v4381_v34 = vsub.f32 %v4323_v16, %v4332_v19  ;;  %v4388_v37 = vand.u32 4294901760, %v4358_v26 }
  0x1f   : > { %290 = vmatpush.msra.mxu0 %v4311_v12  ;;  %431 = vmatpush.msra.mxu2 %v4344_v22  ;;  %v360_v30 = vand.u32 4294901760, %v4344_v22  ;;  %v366_v31 = vand.u32 4294901760, %v4348_v23  ;;  %v372_v32 = vand.u32 4294901760, %v4352_v24  ;;  %v4376_v33 = vsub.f32 %v4338_v21, %v4355_v25  ;;  %p4151_p13 = pneg %p4150_p12 }
  0x20   : > { %491 = vmatpush.msra.mxu3 %v4311_v12  ;;  %v378_v35 = vand.u32 4294901760, %v4362_v27  ;;  %v384_v43 = vand.u32 4294901760, %v4366_v28  ;;  %v4406_v44 = vsub.f32 %v4358_v26, %v4388_v37  ;;  %v390_v50 = vand.u32 4294901760, %v4381_v34 }
  0x21   : > { %292 = vmatpush.msra.mxu0 %v4314_v13  ;;  %434 = vmatpush.msra.mxu2 %v4348_v23  ;;  %v361_v38 = vsub.f32 %v4344_v22, %v360_v30  ;;  %v367_v39 = vsub.f32 %v4348_v23, %v366_v31  ;;  %v726_v41 = vand.u32 4294901760, %v4376_v33  ;;  %v373_v42 = vsub.f32 %v4352_v24, %v372_v32  ;;  %p4156_p3 = pnand %p4155_p2, %p4151_p13 }
  0x22   : > { %493 = vmatpush.msra.mxu3 %v4314_v13  ;;  %v379_v49 = vsub.f32 %v4362_v27, %v378_v35  ;;  %v732_v51 = vand.u32 4294901760, %v4406_v44  ;;  %v4425_v53 = vand.u32 4294901760, %v302_v40  ;;  %v4434_v56 = vand.u32 4294901760, %v4409_v45 }
  0x23   : > { %294 = vmatpush.msra.mxu0 %v4326_v17  ;;  %437 = vmatpush.msra.mxu2 %v4352_v24  ;;  %v362_v46 = vand.u32 4294901760, %v361_v38  ;;  %v368_v47 = vand.u32 4294901760, %v367_v39  ;;  %v727_v54 = vsub.f32 %v4376_v33, %v726_v41  ;;  %v374_v57 = vand.u32 4294901760, %v373_v42 }
  0x24   : > { %495 = vmatpush.msra.mxu3 %v4326_v17  ;;  %v385_v58 = vsub.f32 %v4366_v28, %v384_v43  ;;  %v4442_v59 = vand.u32 4294901760, %v4414_v48  ;;  %v733_v60 = vsub.f32 %v4406_v44, %v732_v51  ;;  %v4450_v61 = vsub.f32 %v4409_v45, %v4434_v56 }
  0x25   : > { %296 = vmatpush.msra.mxu0 %v4329_v18  ;;  %363 = vmatpush.msra.mxu1 %v362_v46  ;;  %v380_v63 = vand.u32 4294901760, %v379_v49  ;;  %v391_v0 = vsub.f32 %v4381_v34, %v390_v50  ;;  %v728_v3 = vand.u32 4294901760, %v727_v54  ;;  %v269_v39 = vsel %vm258_vm0, %v223_v62, 0  ;;  %v4480_v46 = vld [vmem:[%s4291_s12 + $0x8] sm:$0xff]  ;;  %v4504_v62 = vld [vmem:[%s4291_s12] sm:$0xff] }
  0x26   : > { %440 = vmatpush.msra.mxu2 %v4362_v27  ;;  %497 = vmatpush.msra.mxu3 %v4329_v18  ;;  %v4462_v1 = vsub.f32 %v4414_v48, %v4442_v59  ;;  %v738_v22 = vand.u32 4294901760, %v4450_v61  ;;  %v386_v38 = vand.u32 4294901760, %v385_v58  ;;  %v734_v42 = vand.u32 4294901760, %v733_v60 }
  0x27   : > { %298 = vmatpush.msra.mxu0 %v4332_v19  ;;  %369 = vmatpush.msra.mxu1 %v368_v47  ;;  %v392_v47 = vand.u32 4294901760, %v391_v0  ;;  %v4484_v49 = vand.u32 4294901760, %v4480_v46  ;;  %v4486_v54 = vand.u32 4294901760, %v310_v4 }
  0x28   : > { %443 = vmatpush.msra.mxu2 %v4366_v28  ;;  %499 = vmatpush.msra.mxu3 %v4332_v19  ;;  %v744_v40 = vand.u32 4294901760, %v4462_v1  ;;  %v739_v29 = vsub.f32 %v4450_v61, %v738_v22 }
  0x29   : > { %304 = vmatmul.f32.vlgmr.msra.gmra.mxu0 %v4425_v53  ;;  %503 = vmatmul.f32.vlgmr.msra.gmra.mxu3 %v4335_v20  ;;  %v4501_v60 = vsub.f32 %v4480_v46, %v4484_v49 }
  0x2a   : > { %375 = vmatpush.msra.mxu1 %v374_v57  ;;  %446 = vmatpush.msra.mxu2 %v4381_v34  ;;  %v4493_v57 = vand.u32 4294901760, %v269_v39  ;;  %v745_v58 = vsub.f32 %v4462_v1, %v744_v40  ;;  %v740_v23 = vand.u32 4294901760, %v739_v29 }
  0x2b   : > { %449 = vmatmul.f32.vlgmr.msra.gmra.mxu2 %v4281_v5  ;;  %550 = vmatpush.msrb.mxu0 %v360_v30  ;;  %v4491_v30 = vand.u32 4294901760, %v4469_v6  ;;  %v750_v0 = vand.u32 4294901760, %v4501_v60 }
  0x2c   : > { %381 = vmatpush.msra.mxu1 %v380_v63  ;;  %654 = vmatpush.msrb.mxu2 %v4355_v25  ;;  %v4512_v63 = vand.u32 4294901760, %v4504_v62 }
  0x2d   : > { %729 = vmatpush.msrb.mxu3 %v728_v3  ;;  %554 = vmatpush.msrb.mxu0 %v366_v31  ;;  %v224_v31 = vld [vmem:[%s6070_s0 + $0x20] sm:$0xff]  ;;  %v318_v24 = vsub.f32 %v4469_v6, %v4491_v30  ;;  %v746_v3 = vand.u32 4294901760, %v745_v58 }
  0x2e   : > { %387 = vmatpush.msra.mxu1 %v386_v38  ;;  %656 = vmatpush.msrb.mxu2 %v4388_v37  ;;  %v4525_v4 = vsub.f32 %v4504_v62, %v4512_v63  ;;  %v272_v38 = vsel %vm258_vm0, %v224_v31, 0 }
  0x2f   : > { %735 = vmatpush.msrb.mxu3 %v734_v42  ;;  %558 = vmatpush.msrb.mxu0 %v372_v32  ;;  %v4521_v32 = vsub.f32 %v269_v39, %v4493_v57  ;;  %v751_v42 = vsub.f32 %v4501_v60, %v750_v0  ;;  %v4544_v58 = vand.u32 4294901760, %v272_v38 }
  0x30   : > { %393 = vmatpush.msra.mxu1 %v392_v47  ;;  %658 = vmatpush.msrb.mxu2 %v4434_v56  ;;  %v756_v39 = vand.u32 4294901760, %v4525_v4  ;;  %v4537_v47 = vand.u32 4294901760, %v318_v24  ;;  %v242_v24 = vmul.f32 %v4317_v14, %v4317_v14 }
  0x31   : > { %312 = vmatmul.f32.gmra.mxu0 %v4486_v54  ;;  %395 = vmatmul.f32.vlgmr.msra.gmra.mxu1 %v4274_v2  ;;  %v752_v29 = vand.u32 4294901760, %v751_v42  ;;  %v4563_v28 = vsub.f32 %v272_v38, %v4544_v58 }
  0x32   : > { %509 = vmatmul.f32.gmra.mxu3 %v4431_v55  ;;  %607 = vmatpush.msrb.mxu1 %v4308_v11  ;;  %v4540_v11 = vand.u32 4294901760, %v4521_v32 }
  0x33   : > { %454 = vmatmul.f32.gmra.mxu2 %v4385_v36  ;;  %741 = vmatpush.msrb.mxu3 %v740_v23  ;;  %v757_v23 = vsub.f32 %v4525_v4, %v756_v39 }
  0x34   : > { %609 = vmatpush.msrb.mxu1 %v4311_v12  ;;  %660 = vmatpush.msrb.mxu2 %v4442_v59  ;;  %v225_v12 = vld [vmem:[%s6070_s0 + $0x28] sm:$0xff] }
  0x35   : > { %562 = vmatpush.msrb.mxu0 %v378_v35  ;;  %747 = vmatpush.msrb.mxu3 %v746_v3  ;;  %v758_v27 = vand.u32 4294901760, %v757_v23  ;;  %v275_v35 = vsel %vm258_vm0, %v225_v12, 0 }
  0x36   : > { %611 = vmatpush.msrb.mxu1 %v4314_v13  ;;  %662 = vmatpush.msrb.mxu2 %v4484_v49  ;;  %v326_v13 = vsub.f32 %v4521_v32, %v4540_v11  ;;  %v4577_v31 = vand.u32 4294901760, %v275_v35 }
  0x37   : > { %566 = vmatpush.msrb.mxu0 %v384_v43  ;;  %753 = vmatpush.msrb.mxu3 %v752_v29  ;;  %v4575_v43 = vand.u32 4294901760, %v4563_v28  ;;  %v241_v29 = vmul.f32 %v4320_v15, %v4320_v15 }
  0x38   : > { %613 = vmatpush.msrb.mxu1 %v4326_v17  ;;  %664 = vmatpush.msrb.mxu2 %v4512_v63  ;;  %v4572_v17 = vand.u32 4294901760, %v326_v13 }
  0x39   : > { %320 = vmatmul.f32.gmra.mxu0 %v4537_v47  ;;  %399 = vmatmul.f32.gmra.mxu1 %v4305_v10  ;;  %v4705_v12 = vand.u32 4294901760, %v241_v29 }
  0x3a   : > { %515 = vmatmul.f32.gmra.mxu3 %v4491_v30  ;;  %615 = vmatpush.msrb.mxu1 %v4329_v18  ;;  %v334_v18 = vsub.f32 %v4563_v28, %v4575_v43 }
  0x3b   : > { %459 = vmatmul.f32.gmra.mxu2 %v4469_v6  ;;  %570 = vmatpush.msrb.mxu0 %v390_v50 }
  0x3c   : > { %759 = vmatpush.msrb.mxu3 %v758_v27  ;;  %617 = vmatpush.msrb.mxu1 %v4332_v19  ;;  %v4594_v19 = vsub.f32 %v275_v35, %v4577_v31  ;;  %v1115_v27 = vsub.f32 %v241_v29, %v4705_v12  ;;  %v240_v35 = vmul.f32 %v4323_v16, %v4323_v16 }
  0x3d   : > { %916 = vmatpush.msra.mxu2 %v726_v41  ;;  %797 = vmatpush.msra.mxu0 %v4376_v33  ;;  %v245_v41 = vmul.f32 %v4297_v7, %v4297_v7 }
  0x3e   : > { %973 = vmatpush.msra.mxu3 %v4355_v25  ;;  %855 = vmatpush.msra.mxu1 %v4355_v25  ;;  %v4603_v25 = vand.u32 4294901760, %v334_v18  ;;  %v4606_v33 = vand.u32 4294901760, %v4594_v19  ;;  %v1116_v13 = vand.u32 4294901760, %v1115_v27 }
  0x3f   : > { %920 = vmatpush.msra.mxu2 %v732_v51  ;;  %800 = vmatpush.msra.mxu0 %v4406_v44  ;;  %v4649_v44 = vand.u32 4294901760, %v245_v41 }
  0x40   : > { %975 = vmatpush.msra.mxu3 %v4388_v37  ;;  %857 = vmatpush.msra.mxu1 %v4388_v37  ;;  %v342_v34 = vsub.f32 %v4594_v19, %v4606_v33  ;;  %v1117_v15 = vsub.f32 %v1115_v27, %v1116_v13 }
  0x41   : > { %328 = vmatmul.f32.gmra.mxu0 %v4572_v17  ;;  %403 = vmatmul.f32.gmra.mxu1 %v4422_v52  ;;  %v4652_v50 = vsub.f32 %v245_v41, %v4649_v44 }
  0x42   : > { %521 = vmatmul.f32.gmra.mxu3 %v4540_v11  ;;  %924 = vmatpush.msra.mxu2 %v738_v22  ;;  %v4629_v37 = vand.u32 4294901760, %v342_v34  ;;  %v1118_v18 = vand.u32 4294901760, %v1117_v15  ;;  %v1029_v34 = vand.u32 4294901760, %v240_v35 }
  0x43   : > { %464 = vmatmul.f32.gmra.mxu2 %v4521_v32  ;;  %803 = vmatpush.msra.mxu0 %v4450_v61  ;;  %v1092_v51 = vand.u32 4294901760, %v4652_v50 }
  0x44   : > { %977 = vmatpush.msra.mxu3 %v4434_v56  ;;  %859 = vmatpush.msra.mxu1 %v4434_v56  ;;  %v244_v56 = vmul.f32 %v4300_v8, %v4300_v8  ;;  %v1121_v41 = vsub.f32 %v240_v35, %v1029_v34  ;;  %v248_v35 = vmul.f32 %v4414_v48, %v4414_v48 }
  0x45   : > { %928 = vmatpush.msra.mxu2 %v744_v40  ;;  %806 = vmatpush.msra.mxu0 %v4462_v1  ;;  %v243_v40 = vmul.f32 %v4303_v9, %v4303_v9 }
  0x46   : > { %979 = vmatpush.msra.mxu3 %v4442_v59  ;;  %861 = vmatpush.msra.mxu1 %v4442_v59  ;;  %v1093_v59 = vsub.f32 %v4652_v50, %v1092_v51  ;;  %v4667_v61 = vand.u32 4294901760, %v244_v56 }
  0x47   : > { %932 = vmatpush.msra.mxu2 %v750_v0  ;;  %809 = vmatpush.msra.mxu0 %v4501_v60  ;;  %v4683_v60 = vand.u32 4294901760, %v243_v40 }
  0x48   : > { %981 = vmatpush.msra.mxu3 %v4484_v49  ;;  %863 = vmatpush.msra.mxu1 %v4484_v49  ;;  %v1094_v1 = vand.u32 4294901760, %v1093_v59  ;;  %v4670_v22 = vsub.f32 %v244_v56, %v4667_v61  ;;  %v1122_v56 = vand.u32 4294901760, %v1121_v41  ;;  %v251_v59 = vmul.f32 %v4338_v21, %v4338_v21 }
  0x49   : > { %336 = vmatmul.f32.gmra.mxu0 %v4603_v25  ;;  %407 = vmatmul.f32.gmra.mxu1 %v4493_v57  ;;  %v1103_v0 = vsub.f32 %v243_v40, %v4683_v60 }
  0x4a   : > { %527 = vmatmul.f32.gmra.mxu3 %v4575_v43  ;;  %936 = vmatpush.msra.mxu2 %v756_v39  ;;  %v1098_v8 = vand.u32 4294901760, %v4670_v22  ;;  %v1123_v16 = vsub.f32 %v1121_v41, %v1122_v56 }
  0x4b   : > { %469 = vmatmul.f32.gmra.mxu2 %v4563_v28  ;;  %812 = vmatpush.msra.mxu0 %v4525_v4  ;;  %v1104_v9 = vand.u32 4294901760, %v1103_v0  ;;  %v4694_v4 = vand.u32 4294901760, %v242_v24 }
  0x4c   : > { %983 = vmatpush.msra.mxu3 %v4512_v63  ;;  %865 = vmatpush.msra.mxu1 %v4512_v63  ;;  %v1099_v49 = vsub.f32 %v4670_v22, %v1098_v8 }
  0x4d   : > { %v1105_v3 = vsub.f32 %v1103_v0, %v1104_v9  ;;  %v1109_v42 = vsub.f32 %v242_v24, %v4694_v4  ;;  %v249_v24 = vmul.f32 %v4409_v45, %v4409_v45 }
  0x4e   : > { %v1100_v63 = vand.u32 4294901760, %v1099_v49 }
  0x4f   : > { %v1106_v38 = vand.u32 4294901760, %v1105_v3  ;;  %v1110_v39 = vand.u32 4294901760, %v1109_v42  ;;  %v4761_v29 = vand.u32 4294901760, %v249_v24 }
  0x51   : > { %344 = vmatmul.f32.gmra.mxu0 %v4629_v37  ;;  %411 = vmatmul.f32.gmra.mxu1 %v4544_v58  ;;  %v1111_v14 = vsub.f32 %v1109_v42, %v1110_v39 }
  0x52   : > { %533 = vmatmul.f32.gmra.mxu3 %v4606_v33 }
  0x53   : > { %474 = vmatmul.f32.gmra.mxu2 %v4594_v19  ;;  %v1112_v23 = vand.u32 4294901760, %v1111_v14 }
  0x59   : > { %415 = vmatmul.f32.gmra.mxu1 %v4577_v31  ;;  %572 = vmatmul.f32.vlgmr.msrb.gmra.mxu0 %v4274_v2 }
  0x5a   : > { %761 = vmatmul.f32.vlgmr.msrb.gmra.mxu3 %v4274_v2  ;;  %1020 = vmatpush.msrb.mxu0 %v4649_v44 }
  0x5b   : > { %670 = vmatmul.f32.vlgmr.msrb.gmra.mxu2 %v4425_v53  ;;  %1221 = vmatpush.msrb.mxu3 %v4649_v44 }
  0x5c   : > { %1163 = vmatpush.msrb.mxu2 %v4652_v50  ;;  %1022 = vmatpush.msrb.mxu0 %v4667_v61 }
  0x5d   : > { %1223 = vmatpush.msrb.mxu3 %v4667_v61 }
  0x5e   : > { %1166 = vmatpush.msrb.mxu2 %v4670_v22  ;;  %1024 = vmatpush.msrb.mxu0 %v4683_v60  ;;  %v4724_v22 = vand.u32 4294901760, %v251_v59 }
  0x5f   : > { %1225 = vmatpush.msrb.mxu3 %v4683_v60 }
  0x60   : > { %1169 = vmatpush.msrb.mxu2 %v1103_v0  ;;  %1026 = vmatpush.msrb.mxu0 %v4694_v4  ;;  %v4729_v40 = vsub.f32 %v251_v59, %v4724_v22  ;;  %v4779_v59 = vand.u32 4294901760, %v248_v35 }
  0x61   : > { %576 = vmatmul.f32.gmra.mxu0 %v4305_v10  ;;  %619 = vmatmul.f32.vlgmr.msrb.gmra.mxu1 %v4274_v2 }
  0x62   : > { %765 = vmatmul.f32.gmra.mxu3 %v4305_v10  ;;  %1095 = vmatpush.msrb.mxu1 %v1094_v1  ;;  %v1124_v1 = vand.u32 4294901760, %v1123_v16  ;;  %v1458_v50 = vand.u32 4294901760, %v4729_v40 }
  0x63   : > { %678 = vmatmul.f32.gmra.mxu2 %v4486_v54  ;;  %1227 = vmatpush.msrb.mxu3 %v4694_v4 }
  0x64   : > { %1101 = vmatpush.msrb.mxu1 %v1100_v63  ;;  %1172 = vmatpush.msrb.mxu2 %v1109_v42 }
  0x65   : > { %1028 = vmatpush.msrb.mxu0 %v4705_v12  ;;  %1229 = vmatpush.msrb.mxu3 %v4705_v12 }
  0x66   : > { %1107 = vmatpush.msrb.mxu1 %v1106_v38  ;;  %1175 = vmatpush.msrb.mxu2 %v1115_v27 }
  0x67   : > { %1030 = vmatpush.msrb.mxu0 %v1029_v34  ;;  %1231 = vmatpush.msrb.mxu3 %v1029_v34 }
  0x68   : > { %1113 = vmatpush.msrb.mxu1 %v1112_v23  ;;  %1178 = vmatpush.msrb.mxu2 %v1121_v41 }
  0x69   : > { %580 = vmatmul.f32.gmra.mxu0 %v4422_v52  ;;  %623 = vmatmul.f32.gmra.mxu1 %v4305_v10 }
  0x6a   : > { %769 = vmatmul.f32.gmra.mxu3 %v4422_v52  ;;  %1119 = vmatpush.msrb.mxu1 %v1118_v18 }
  0x6b   : > { %686 = vmatmul.f32.gmra.mxu2 %v4537_v47 }
  0x6c   : > { %1125 = vmatpush.msrb.mxu1 %v1124_v1 }
  0x71   : > { %584 = vmatmul.f32.gmra.mxu0 %v4493_v57  ;;  %627 = vmatmul.f32.gmra.mxu1 %v4422_v52 }
  0x72   : > { %773 = vmatmul.f32.gmra.mxu3 %v4493_v57 }
  0x73   : > { %694 = vmatmul.f32.gmra.mxu2 %v4572_v17 }
  0x79   : > { %588 = vmatmul.f32.gmra.mxu0 %v4544_v58  ;;  %631 = vmatmul.f32.gmra.mxu1 %v4493_v57 }
  0x7a   : > { %777 = vmatmul.f32.gmra.mxu3 %v4544_v58 }
  0x7b   : > { %702 = vmatmul.f32.gmra.mxu2 %v4603_v25 }
  0x81   : > { %592 = vmatmul.f32.gmra.mxu0 %v4577_v31  ;;  %635 = vmatmul.f32.gmra.mxu1 %v4544_v58 }
  0x82   : > { %781 = vmatmul.f32.gmra.mxu3 %v4577_v31 }
  0x83   : > { %710 = vmatmul.f32.gmra.mxu2 %v4629_v37 }
  0x89   : > { %639 = vmatmul.f32.gmra.mxu1 %v4577_v31  ;;  %815 = vmatmul.f32.vlgmr.msra.gmra.mxu0 %v4281_v5 }
  0x8a   : > { %985 = vmatmul.f32.vlgmr.msra.gmra.mxu3 %v4274_v2  ;;  %1282 = vmatpush.msra.mxu0 %v1092_v51  ;;  %v1459_v51 = vsub.f32 %v4729_v40, %v1458_v50 }
  0x8b   : > { %938 = vmatmul.f32.vlgmr.msra.gmra.mxu2 %v4274_v2 }
  0x8c   : > { %1286 = vmatpush.msra.mxu0 %v1098_v8  ;;  %1386 = vmatpush.msra.mxu2 %v4724_v22  ;;  %v250_v8 = vmul.f32 %v4358_v26, %v4358_v26  ;;  %v1460_v63 = vand.u32 4294901760, %v1459_v51  ;;  %v1475_v51 = vsub.f32 %v248_v35, %v4779_v59 }
  0x8e   : > { %1290 = vmatpush.msra.mxu0 %v1104_v9  ;;  %v4742_v0 = vand.u32 4294901760, %v250_v8  ;;  %1461 = vmatpush.msra.mxu3 %v1460_v63 }
  0x90   : > { %1294 = vmatpush.msra.mxu0 %v1110_v39  ;;  %1388 = vmatpush.msra.mxu2 %v4742_v0 }
  0x91   : > { %820 = vmatmul.f32.gmra.mxu0 %v4385_v36  ;;  %869 = vmatmul.f32.vlgmr.msra.gmra.mxu1 %v4335_v20 }
  0x92   : > { %989 = vmatmul.f32.gmra.mxu3 %v4305_v10  ;;  %1339 = vmatpush.msra.mxu1 %v4649_v44  ;;  %v4748_v44 = vsub.f32 %v250_v8, %v4742_v0  ;;  %v1476_v8 = vand.u32 4294901760, %v1475_v51 }
  0x93   : > { %942 = vmatmul.f32.gmra.mxu2 %v4305_v10  ;;  %1298 = vmatpush.msra.mxu0 %v1116_v13 }
  0x94   : > { %1341 = vmatpush.msra.mxu1 %v4667_v61  ;;  %v1464_v61 = vand.u32 4294901760, %v4748_v44  ;;  %1390 = vmatpush.msra.mxu2 %v4761_v29 }
  0x95   : > { %1302 = vmatpush.msra.mxu0 %v1122_v56 }
  0x96   : > { %1343 = vmatpush.msra.mxu1 %v4683_v60  ;;  %v1465_v60 = vsub.f32 %v4748_v44, %v1464_v61  ;;  %1392 = vmatpush.msra.mxu2 %v4779_v59 }
  0x98   : > { %1345 = vmatpush.msra.mxu1 %v4694_v4  ;;  %v1466_v14 = vand.u32 4294901760, %v1465_v60  ;;  %v4766_v4 = vsub.f32 %v249_v24, %v4761_v29  ;;  %v1477_v60 = vsub.f32 %v1475_v51, %v1476_v8 }
  0x99   : > { %825 = vmatmul.f32.gmra.mxu0 %v4469_v6  ;;  %875 = vmatmul.f32.gmra.mxu1 %v4431_v55 }
  0x9a   : > { %993 = vmatmul.f32.gmra.mxu3 %v4422_v52  ;;  %1347 = vmatpush.msra.mxu1 %v4705_v12  ;;  %v1470_v12 = vand.u32 4294901760, %v4766_v4 }
  0x9b   : > { %946 = vmatmul.f32.gmra.mxu2 %v4422_v52  ;;  %1467 = vmatpush.msra.mxu3 %v1466_v14 }
  0x9c   : > { %1349 = vmatpush.msra.mxu1 %v1029_v34  ;;  %v1471_v15 = vsub.f32 %v4766_v4, %v1470_v12 }
  0x9e   : > { %v1472_v16 = vand.u32 4294901760, %v1471_v15 }
  0xa0   : > { %1473 = vmatpush.msra.mxu3 %v1472_v16 }
  0xa1   : > { %830 = vmatmul.f32.gmra.mxu0 %v4521_v32  ;;  %881 = vmatmul.f32.gmra.mxu1 %v4491_v30 }
  0xa2   : > { %997 = vmatmul.f32.gmra.mxu3 %v4493_v57 }
  0xa3   : > { %950 = vmatmul.f32.gmra.mxu2 %v4493_v57 }
  0xa6   : > { %v305_v49 = vpop.f32.mrf.mxu0 }
  0xa9   : > { %835 = vmatmul.f32.gmra.mxu0 %v4563_v28  ;;  %887 = vmatmul.f32.gmra.mxu1 %v4540_v11 }
  0xaa   : > { %1001 = vmatmul.f32.gmra.mxu3 %v4544_v58 }
  0xab   : > { %954 = vmatmul.f32.gmra.mxu2 %v4544_v58 }
  0xac   : > { %v504_v9 = vpop.f32.mrf.mxu3 }
  0xae   : > { %v313_v3 = vpop.f32.mrf.mxu0  ;;  %v396_v38 = vpop.f32.mrf.mxu1 }
  0xaf   : > { %v397_v42 = vadd.f32 %v396_v38, %v305_v49  ;;  %v450_v39 = vpop.f32.mrf.mxu2  ;;  %v247_v49 = vmul.f32 %v4480_v46, %v4480_v46 }
  0xb1   : > { %v451_v23 = vadd.f32 %v450_v39, %v397_v42  ;;  %840 = vmatmul.f32.gmra.mxu0 %v4594_v19  ;;  %893 = vmatmul.f32.gmra.mxu1 %v4575_v43  ;;  %v4792_v24 = vand.u32 4294901760, %v247_v49 }
  0xb2   : > { %1005 = vmatmul.f32.gmra.mxu3 %v4577_v31 }
  0xb3   : > { %958 = vmatmul.f32.gmra.mxu2 %v4577_v31  ;;  %v4772_v27 = vadd.f32 %v504_v9, %v451_v23  ;;  %v1478_v23 = vand.u32 4294901760, %v1477_v60 }
  0xb4   : > { %1394 = vmatpush.msra.mxu2 %v4792_v24 }
  0xb5   : > { %v510_v13 = vpop.f32.mrf.mxu3  ;;  %1479 = vmatpush.msra.mxu3 %v1478_v23 }
  0xb6   : > { %v321_v18 = vpop.f32.mrf.mxu0  ;;  %v400_v34 = vpop.f32.mrf.mxu1 }
  0xb7   : > { %v401_v41 = vadd.f32 %v400_v34, %v313_v3  ;;  %v455_v56 = vpop.f32.mrf.mxu2  ;;  %v246_v3 = vmul.f32 %v4504_v62, %v4504_v62 }
  0xb9   : > { %v456_v1 = vadd.f32 %v455_v56, %v401_v41  ;;  %899 = vmatmul.f32.gmra.mxu1 %v4606_v33  ;;  %1036 = vmatmul.f32.vlgmr.msrb.gmra.mxu0 %v4425_v53  ;;  %v4799_v15 = vand.u32 4294901760, %v246_v3 }
  0xba   : > { %1235 = vmatmul.f32.vlgmr.msrb.gmra.mxu3 %v4335_v20  ;;  %1529 = vmatpush.msrb.mxu0 %v4729_v40 }
  0xbb   : > { %1181 = vmatmul.f32.vlgmr.msrb.gmra.mxu2 %v4281_v5  ;;  %v4789_v63 = vadd.f32 %v510_v13, %v456_v1  ;;  %v1481_v13 = vsub.f32 %v247_v49, %v4792_v24 }
  0xbc   : > { %1532 = vmatpush.msrb.mxu0 %v4748_v44  ;;  %1396 = vmatpush.msra.mxu2 %v4799_v15 }
  0xbd   : > { %v516_v9 = vpop.f32.mrf.mxu3  ;;  %v1482_v34 = vand.u32 4294901760, %v1481_v13 }
  0xbe   : > { %v329_v38 = vpop.f32.mrf.mxu0  ;;  %v404_v42 = vpop.f32.mrf.mxu1  ;;  %1535 = vmatpush.msrb.mxu0 %v4766_v4  ;;  %1648 = vmatpush.msrb.mxu2 %v1458_v50 }
  0xbf   : > { %v405_v39 = vadd.f32 %v404_v42, %v321_v18  ;;  %v460_v14 = vpop.f32.mrf.mxu2  ;;  %v1487_v18 = vsub.f32 %v246_v3, %v4799_v15  ;;  %v1483_v41 = vsub.f32 %v1481_v13, %v1482_v34 }
  0xc0   : > { %1538 = vmatpush.msrb.mxu0 %v1475_v51  ;;  %1652 = vmatpush.msrb.mxu2 %v1464_v61 }
  0xc1   : > { %v461_v35 = vadd.f32 %v460_v14, %v405_v39  ;;  %1044 = vmatmul.f32.gmra.mxu0 %v4486_v54  ;;  %1127 = vmatmul.f32.vlgmr.msrb.gmra.mxu1 %v4274_v2  ;;  %v1488_v16 = vand.u32 4294901760, %v1487_v18  ;;  %v1484_v49 = vand.u32 4294901760, %v1483_v41 }
  0xc2   : > { %1241 = vmatmul.f32.gmra.mxu3 %v4431_v55  ;;  %1587 = vmatpush.msrb.mxu1 %v4724_v22 }
  0xc3   : > { %1186 = vmatmul.f32.gmra.mxu2 %v4385_v36  ;;  %v4808_v56 = vadd.f32 %v516_v9, %v461_v35  ;;  %v1489_v39 = vsub.f32 %v1487_v18, %v1488_v16  ;;  %1485 = vmatpush.msra.mxu3 %v1484_v49 }
  0xc4   : > { %1589 = vmatpush.msrb.mxu1 %v4742_v0  ;;  %1541 = vmatpush.msrb.mxu0 %v1481_v13 }
  0xc5   : > { %v522_v1 = vpop.f32.mrf.mxu3  ;;  %v1490_v14 = vand.u32 4294901760, %v1489_v39  ;;  %1656 = vmatpush.msrb.mxu2 %v1470_v12 }
  0xc6   : > { %v337_v60 = vpop.f32.mrf.mxu0  ;;  %v408_v42 = vpop.f32.mrf.mxu1  ;;  %1591 = vmatpush.msrb.mxu1 %v4761_v29  ;;  %1544 = vmatpush.msrb.mxu0 %v1487_v18 }
  0xc7   : > { %v409_v3 = vadd.f32 %v408_v42, %v329_v38  ;;  %v465_v9 = vpop.f32.mrf.mxu2  ;;  %1660 = vmatpush.msrb.mxu2 %v1476_v8  ;;  %1491 = vmatpush.msra.mxu3 %v1490_v14 }
  0xc8   : > { %1593 = vmatpush.msrb.mxu1 %v4779_v59 }
  0xc9   : > { %v466_v40 = vadd.f32 %v465_v9, %v409_v3  ;;  %1052 = vmatmul.f32.gmra.mxu0 %v4537_v47  ;;  %1131 = vmatmul.f32.gmra.mxu1 %v4305_v10 }
  0xca   : > { %1247 = vmatmul.f32.gmra.mxu3 %v4491_v30  ;;  %1664 = vmatpush.msrb.mxu2 %v1482_v34 }
  0xcb   : > { %1191 = vmatmul.f32.gmra.mxu2 %v4469_v6  ;;  %v4823_v50 = vadd.f32 %v522_v1, %v466_v40  ;;  %1705 = vmatpush.msrb.mxu3 %v4724_v22 }
  0xcc   : > { %1595 = vmatpush.msrb.mxu1 %v4792_v24  ;;  %1668 = vmatpush.msrb.mxu2 %v1488_v16 }
  0xcd   : > { %v528_v44 = vpop.f32.mrf.mxu3  ;;  %1707 = vmatpush.msrb.mxu3 %v4742_v0 }
  0xce   : > { %v345_v61 = vpop.f32.mrf.mxu0  ;;  %v412_v4 = vpop.f32.mrf.mxu1  ;;  %1597 = vmatpush.msrb.mxu1 %v4799_v15 }
  0xcf   : > { %v413_v12 = vadd.f32 %v412_v4, %v337_v60  ;;  %v470_v51 = vpop.f32.mrf.mxu2  ;;  %1709 = vmatpush.msrb.mxu3 %v4761_v29 }
  0xd1   : > { %v471_v8 = vadd.f32 %v470_v51, %v413_v12  ;;  %1060 = vmatmul.f32.gmra.mxu0 %v4572_v17  ;;  %1135 = vmatmul.f32.gmra.mxu1 %v4422_v52 }
  0xd2   : > { %1253 = vmatmul.f32.gmra.mxu3 %v4540_v11 }
  0xd3   : > { %1196 = vmatmul.f32.gmra.mxu2 %v4521_v32  ;;  %v4835_v22 = vadd.f32 %v528_v44, %v471_v8  ;;  %1711 = vmatpush.msrb.mxu3 %v4779_v59 }
  0xd5   : > { %6092 = vst [vmem:[#allocation5_spill] sm:$0xff] %v4835_v22  ;;  %v534_v0 = vpop.f32.mrf.mxu3  ;;  %1713 = vmatpush.msrb.mxu3 %v4792_v24 }
  0xd6   : > { %v416_v38 = vpop.f32.mrf.mxu1  ;;  %v4839_v29 = vpop.f32.mrf.mxu0 }
  0xd7   : > { %v417_v23 = vadd.f32 %v416_v38, %v345_v61  ;;  %v475_v13 = vpop.f32.mrf.mxu2  ;;  %1715 = vmatpush.msrb.mxu3 %v4799_v15 }
  0xd9   : > { %v476_v35 = vadd.f32 %v475_v13, %v417_v23  ;;  %1068 = vmatmul.f32.gmra.mxu0 %v4603_v25  ;;  %1139 = vmatmul.f32.gmra.mxu1 %v4493_v57 }
  0xda   : > { %1259 = vmatmul.f32.gmra.mxu3 %v4575_v43 }
  0xdb   : > { %1201 = vmatmul.f32.gmra.mxu2 %v4563_v28  ;;  %v4846_v59 = vadd.f32 %v534_v0, %v476_v35  ;;  %v257_v35 = vmul.f32 %v4338_v21, %v4297_v7 }
  0xdd   : > { %6093 = vst [vmem:[#allocation6_spill] sm:$0xff] %v4846_v59  ;;  %v762_v34 = vpop.f32.mrf.mxu3 }
  0xde   : > { %v4848_v24 = vpop.f32.mrf.mxu0  ;;  %v4850_v18 = vpop.f32.mrf.mxu1 }
  0xdf   : > { %v671_v41 = vpop.f32.mrf.mxu2 }
  0xe0   : > { %v4852_v16 = vadd.f32 %v762_v34, %v671_v41  ;;  %v4899_v34 = vand.u32 4294901760, %v257_v35 }
  0xe1   : > { %1076 = vmatmul.f32.gmra.mxu0 %v4629_v37  ;;  %1143 = vmatmul.f32.gmra.mxu1 %v4544_v58 }
  0xe2   : > { %1265 = vmatmul.f32.gmra.mxu3 %v4606_v33  ;;  %v4903_v41 = vsub.f32 %v257_v35, %v4899_v34 }
  0xe3   : > { %1206 = vmatmul.f32.gmra.mxu2 %v4594_v19 }
  0xe5   : > { %v766_v15 = vpop.f32.mrf.mxu3 }
  0xe6   : > { %v4858_v1 = vpop.f32.mrf.mxu0  ;;  %v4860_v49 = vpop.f32.mrf.mxu1 }
  0xe7   : > { %v679_v60 = vpop.f32.mrf.mxu2 }
  0xe8   : > { %v4862_v42 = vadd.f32 %v766_v15, %v679_v60 }
  0xe9   : > { %1147 = vmatmul.f32.gmra.mxu1 %v4577_v31  ;;  %1304 = vmatmul.f32.vlgmr.msra.gmra.mxu0 %v4274_v2 }
  0xea   : > { %1493 = vmatmul.f32.vlgmr.msra.gmra.mxu3 %v4274_v2  ;;  %1752 = vmatpush.msra.mxu0 %v4899_v34 }
  0xeb   : > { %1402 = vmatmul.f32.vlgmr.msra.gmra.mxu2 %v4425_v53  ;;  %1953 = vmatpush.msra.mxu3 %v4899_v34 }
  0xec   : > { %1895 = vmatpush.msra.mxu2 %v4903_v41 }
  0xed   : > { %v770_v39 = vpop.f32.mrf.mxu3 }
  0xee   : > { %v4868_v3 = vpop.f32.mrf.mxu0  ;;  %v4870_v9 = vpop.f32.mrf.mxu1 }
  0xef   : > { %v687_v14 = vpop.f32.mrf.mxu2 }
  0xf0   : > { %v4872_v40 = vadd.f32 %v770_v39, %v687_v14  ;;  %v6075_v14 = vand.u32 4294901760, %v4903_v41 }
  0xf1   : > { %1308 = vmatmul.f32.gmra.mxu0 %v4305_v10  ;;  %1351 = vmatmul.f32.vlgmr.msra.gmra.mxu1 %v4274_v2 }
  0xf2   : > { %1497 = vmatmul.f32.gmra.mxu3 %v4305_v10 }
  0xf3   : > { %1410 = vmatmul.f32.gmra.mxu2 %v4486_v54 }
  0xf5   : > { %v774_v44 = vpop.f32.mrf.mxu3 }
  0xf6   : > { %v4878_v61 = vpop.f32.mrf.mxu0  ;;  %v4880_v4 = vpop.f32.mrf.mxu1 }
  0xf7   : > { %6094 = vst [vmem:[#allocation7_spill] sm:$0xff] %v4878_v61  ;;  %v695_v12 = vpop.f32.mrf.mxu2 }
  0xf8   : > { %v4882_v51 = vadd.f32 %v774_v44, %v695_v12  ;;  %v4127_v44 = vld [vmem:[%s4286_s9 + $0x20] sm:$0xff] }
  0xf9   : > { %1312 = vmatmul.f32.gmra.mxu0 %v4422_v52  ;;  %1355 = vmatmul.f32.gmra.mxu1 %v4305_v10  ;;  %v256_v12 = vmul.f32 %v4127_v44, %v4358_v26 }
  0xfa   : > { %1501 = vmatmul.f32.gmra.mxu3 %v4422_v52 }
  0xfb   : > { %1418 = vmatmul.f32.gmra.mxu2 %v4537_v47 }
  0xfd   : > { %v778_v8 = vpop.f32.mrf.mxu3 }
  0xfe   : > { %v4888_v0 = vpop.f32.mrf.mxu0  ;;  %v4890_v38 = vpop.f32.mrf.mxu1 }
  0xff   : > { %6095 = vst [vmem:[#allocation8_spill] sm:$0xff] %v4888_v0  ;;  %v703_v23 = vpop.f32.mrf.mxu2 }
 0x100   : > { %6096 = vst [vmem:[#allocation9_spill] sm:$0xff] %v4890_v38  ;;  %v4892_v13 = vadd.f32 %v778_v8, %v703_v23  ;;  %v1825_v8 = vsub.f32 %v4903_v41, %v6075_v14  ;;  %v4921_v23 = vand.u32 4294901760, %v256_v12 }
 0x101   : > { %1316 = vmatmul.f32.gmra.mxu0 %v4493_v57  ;;  %1359 = vmatmul.f32.gmra.mxu1 %v4422_v52 }
 0x102   : > { %1505 = vmatmul.f32.gmra.mxu3 %v4493_v57  ;;  %v1826_v35 = vand.u32 4294901760, %v1825_v8  ;;  %1754 = vmatpush.msra.mxu0 %v4921_v23  ;;  %v4128_v8 = vld [vmem:[%s4286_s9 + $0x18] sm:$0xff] }
 0x103   : > { %1426 = vmatmul.f32.gmra.mxu2 %v4572_v17  ;;  %1955 = vmatpush.msra.mxu3 %v4921_v23 }
 0x104   : > { %1827 = vmatpush.msra.mxu1 %v1826_v35 }
 0x105   : > { %v782_v15 = vpop.f32.mrf.mxu3 }
 0x106   : > { %v4907_v7 = vpop.f32.mrf.mxu1  ;;  %v816_v21 = vpop.f32.mrf.mxu0 }
 0x107   : > { %6097 = vst [vmem:[#allocation10_spill] sm:$0xff] %v4907_v7  ;;  %v711_v60 = vpop.f32.mrf.mxu2  ;;  %v817_v26 = vadd.f32 %v816_v21, %v4852_v16 }
 0x108   : > { %v4910_v39 = vadd.f32 %v782_v15, %v711_v60  ;;  %v4925_v15 = vsub.f32 %v256_v12, %v4921_v23  ;;  %v255_v12 = vmul.f32 %v4128_v8, %v4409_v45 }
 0x109   : > { %1320 = vmatmul.f32.gmra.mxu0 %v4544_v58  ;;  %1363 = vmatmul.f32.gmra.mxu1 %v4493_v57 }
 0x10a   : > { %1509 = vmatmul.f32.gmra.mxu3 %v4544_v58  ;;  %1898 = vmatpush.msra.mxu2 %v4925_v15  ;;  %v6076_v59 = vand.u32 4294901760, %v4925_v15  ;;  %v4940_v21 = vand.u32 4294901760, %v255_v12 }
 0x10b   : > { %1434 = vmatmul.f32.gmra.mxu2 %v4603_v25 }
 0x10c   : > { %v1831_v16 = vsub.f32 %v4925_v15, %v6076_v59  ;;  %v4946_v45 = vsub.f32 %v255_v12, %v4940_v21  ;;  %1756 = vmatpush.msra.mxu0 %v4940_v21  ;;  %1957 = vmatpush.msra.mxu3 %v4940_v21 }
 0x10d   : > { %v986_v60 = vpop.f32.mrf.mxu3 }
 0x10e   : > { %v821_v44 = vpop.f32.mrf.mxu0  ;;  %v870_v7 = vpop.f32.mrf.mxu1  ;;  %v1832_v35 = vand.u32 4294901760, %v1831_v16  ;;  %1901 = vmatpush.msra.mxu2 %v4946_v45  ;;  %v6077_v59 = vand.u32 4294901760, %v4946_v45  ;;  %v4129_v16 = vld [vmem:[%s4286_s9 + $0x10] sm:$0xff] }
 0x10f   : > { %v871_v14 = vadd.f32 %v870_v7, %v817_v26  ;;  %v939_v0 = vpop.f32.mrf.mxu2  ;;  %v254_v12 = vmul.f32 %v4129_v16, %v4414_v48 }
 0x110   : > { %1833 = vmatpush.msra.mxu1 %v1832_v35 }
 0x111   : > { %v940_v38 = vadd.f32 %v939_v0, %v871_v14  ;;  %1324 = vmatmul.f32.gmra.mxu0 %v4577_v31  ;;  %1367 = vmatmul.f32.gmra.mxu1 %v4544_v58  ;;  %v822_v0 = vadd.f32 %v821_v44, %v4862_v42  ;;  %v1837_v42 = vsub.f32 %v4946_v45, %v6077_v59  ;;  %v4961_v44 = vand.u32 4294901760, %v254_v12 }
 0x112   : > { %1513 = vmatmul.f32.gmra.mxu3 %v4577_v31 }
 0x113   : > { %v4942_v7 = vadd.f32 %v986_v60, %v940_v38  ;;  %1442 = vmatmul.f32.gmra.mxu2 %v4629_v37  ;;  %v4967_v48 = vsub.f32 %v254_v12, %v4961_v44  ;;  %1758 = vmatpush.msra.mxu0 %v4961_v44 }
 0x114   : > { %1959 = vmatpush.msra.mxu3 %v4961_v44 }
 0x115   : > { %6098 = vst [vmem:[#allocation11_spill] sm:$0xff] %v4942_v7  ;;  %v990_v14 = vpop.f32.mrf.mxu3  ;;  %1904 = vmatpush.msra.mxu2 %v4967_v48  ;;  %v6078_v59 = vand.u32 4294901760, %v4967_v48 }
 0x116   : > { %v826_v26 = vpop.f32.mrf.mxu0  ;;  %v876_v8 = vpop.f32.mrf.mxu1 }
 0x117   : > { %v877_v38 = vadd.f32 %v876_v8, %v822_v0  ;;  %v943_v60 = vpop.f32.mrf.mxu2  ;;  %v1838_v0 = vand.u32 4294901760, %v1837_v42  ;;  %v827_v8 = vadd.f32 %v826_v26, %v4872_v40  ;;  %v4130_v42 = vld [vmem:[%s4286_s9 + $0x8] sm:$0xff]  ;;  %v1843_v40 = vsub.f32 %v4967_v48, %v6078_v59 }
 0x118   : > { %v253_v12 = vmul.f32 %v4130_v42, %v4480_v46 }
 0x119   : > { %v944_v7 = vadd.f32 %v943_v60, %v877_v38  ;;  %1371 = vmatmul.f32.gmra.mxu1 %v4577_v31  ;;  %1547 = vmatmul.f32.vlgmr.msrb.gmra.mxu0 %v4281_v5 }
 0x11a   : > { %1717 = vmatmul.f32.vlgmr.msrb.gmra.mxu3 %v4274_v2  ;;  %1839 = vmatpush.msra.mxu1 %v1838_v0  ;;  %v4982_v26 = vand.u32 4294901760, %v253_v12 }
 0x11b   : > { %v4963_v35 = vadd.f32 %v990_v14, %v944_v7  ;;  %1670 = vmatmul.f32.vlgmr.msrb.gmra.mxu2 %v4274_v2 }
 0x11c   : > { %v4988_v46 = vsub.f32 %v253_v12, %v4982_v26  ;;  %1760 = vmatpush.msra.mxu0 %v4982_v26  ;;  %1961 = vmatpush.msra.mxu3 %v4982_v26 }
 0x11d   : > { %6099 = vst [vmem:[#allocation12_spill] sm:$0xff] %v4963_v35  ;;  %v994_v38 = vpop.f32.mrf.mxu3 }
 0x11e   : > { %v831_v60 = vpop.f32.mrf.mxu0  ;;  %v882_v16 = vpop.f32.mrf.mxu1  ;;  %1907 = vmatpush.msra.mxu2 %v4988_v46 }
 0x11f   : > { %v883_v7 = vadd.f32 %v882_v16, %v827_v8  ;;  %v947_v14 = vpop.f32.mrf.mxu2  ;;  %v1844_v8 = vand.u32 4294901760, %v1843_v40  ;;  %v832_v16 = vadd.f32 %v831_v60, %v4882_v51 }
 0x121   : > { %v948_v35 = vadd.f32 %v947_v14, %v883_v7  ;;  %1552 = vmatmul.f32.gmra.mxu0 %v4385_v36  ;;  %1601 = vmatmul.f32.vlgmr.msrb.gmra.mxu1 %v4335_v20  ;;  %v4131_v14 = vld [vmem:[%s4286_s9] sm:$0xff]  ;;  %s4067_s9 = sshll.u32 %s205_s8, 3 }
 0x122   : > { %1721 = vmatmul.f32.gmra.mxu3 %v4305_v10  ;;  %v252_v42 = vmul.f32 %v4131_v14, %v4504_v62  ;;  %1845 = vmatpush.msra.mxu1 %v1844_v8  ;;  %v227_v14 = vld [vmem:[%s6071_s1 + $0x8] sm:$0xff]  ;;  %s207_s14 = scalar_lea.vmem [#allocation2], %s4067_s9 }
 0x123   : > { %v4984_v0 = vadd.f32 %v994_v38, %v948_v35  ;;  %1674 = vmatmul.f32.gmra.mxu2 %v4305_v10  ;;  %v1848_v35 = vand.u32 4294901760, %v4988_v46  ;;  %s3989_s20 = sshll.u32 %s207_s14, 4  ;;  %s3990_s20 = int_to_ptr.vmem [resolvable:$true] %s3989_s20 }
 0x124   : > { %v4997_v40 = vand.u32 4294901760, %v252_v42 }
 0x125   : > { %6100 = vst [vmem:[#allocation13_spill] sm:$0xff] %v4984_v0  ;;  %v998_v7 = vpop.f32.mrf.mxu3  ;;  %v1849_v0 = vsub.f32 %v4988_v46, %v1848_v35 }
 0x126   : > { %v836_v59 = vpop.f32.mrf.mxu0  ;;  %v888_v61 = vpop.f32.mrf.mxu1  ;;  %v1853_v62 = vsub.f32 %v252_v42, %v4997_v40  ;;  %1762 = vmatpush.msra.mxu0 %v4997_v40  ;;  %1963 = vmatpush.msra.mxu3 %v4997_v40  ;;  %v5015_v42 = vand.u32 4294901760, %v227_v14 }
 0x127   : > { %v889_v38 = vadd.f32 %v888_v61, %v832_v16  ;;  %v951_v12 = vpop.f32.mrf.mxu2  ;;  %v1850_v51 = vand.u32 4294901760, %v1849_v0  ;;  %v837_v8 = vadd.f32 %v836_v59, %v4892_v13  ;;  %v6102_v0 = vand.u32 4294901760, %v4903_v41 }
 0x128   : > { %v1854_v61 = vand.u32 4294901760, %v1853_v62  ;;  %1910 = vmatpush.msra.mxu2 %v1853_v62  ;;  %v5023_v13 = vsub.f32 %v227_v14, %v5015_v42 }
 0x129   : > { %v952_v22 = vadd.f32 %v951_v12, %v889_v38  ;;  %1557 = vmatmul.f32.gmra.mxu0 %v4469_v6  ;;  %1607 = vmatmul.f32.gmra.mxu1 %v4431_v55 }
 0x12a   : > { %1725 = vmatmul.f32.gmra.mxu3 %v4422_v52  ;;  %1851 = vmatpush.msra.mxu1 %v1850_v51  ;;  %v1855_v16 = vsub.f32 %v1853_v62, %v1854_v61  ;;  %v6103_v51 = vand.u32 4294901760, %v4925_v15  ;;  %v5030_v15 = vand.u32 4294901760, %v5023_v13  ;;  %v6104_v62 = vand.u32 4294901760, %v4946_v45 }
 0x12b   : > { %v5005_v60 = vadd.f32 %v998_v7, %v952_v22  ;;  %1678 = vmatmul.f32.gmra.mxu2 %v4422_v52  ;;  %2014 = vmatpush.msrb.mxu0 %v6102_v0  ;;  %v6105_v0 = vand.u32 4294901760, %v4967_v48 }
 0x12c   : > { %2141 = vmatpush.msrb.mxu2 %v5015_v42  ;;  %v2210_v14 = vsub.f32 %v5023_v13, %v5030_v15 }
 0x12d   : > { %6101 = vst [vmem:[#allocation14_spill] sm:$0xff] %v5005_v60  ;;  %v1002_v46 = vpop.f32.mrf.mxu3  ;;  %v1856_v60 = vand.u32 4294901760, %v1855_v16  ;;  %2018 = vmatpush.msrb.mxu0 %v6103_v51 }
 0x12e   : > { %v841_v22 = vpop.f32.mrf.mxu0  ;;  %v894_v7 = vpop.f32.mrf.mxu1 }
 0x12f   : > { %v895_v38 = vadd.f32 %v894_v7, %v837_v8  ;;  %v955_v12 = vpop.f32.mrf.mxu2  ;;  %1857 = vmatpush.msra.mxu1 %v1856_v60  ;;  %2022 = vmatpush.msrb.mxu0 %v6104_v62  ;;  %v842_v8 = vadd.f32 %v841_v22, %v4910_v39 }
 0x131   : > { %v956_v59 = vadd.f32 %v955_v12, %v895_v38  ;;  %1562 = vmatmul.f32.gmra.mxu0 %v4521_v32  ;;  %1613 = vmatmul.f32.gmra.mxu1 %v4491_v30  ;;  %v5041_v12 = vand.u32 4294901760, %v2210_v14 }
 0x132   : > { %1729 = vmatmul.f32.gmra.mxu3 %v4493_v57  ;;  %2071 = vmatpush.msrb.mxu1 %v4899_v34 }
 0x133   : > { %v5026_v41 = vadd.f32 %v1002_v46, %v956_v59  ;;  %1682 = vmatmul.f32.gmra.mxu2 %v4493_v57  ;;  %2026 = vmatpush.msrb.mxu0 %v6105_v0 }
 0x134   : > { %2073 = vmatpush.msrb.mxu1 %v4921_v23  ;;  %2212 = vmatpush.msrb.mxu3 %v5041_v12 }
 0x135   : > { %v1006_v16 = vpop.f32.mrf.mxu3  ;;  %2030 = vmatpush.msrb.mxu0 %v1848_v35 }
 0x136   : > { %v900_v60 = vpop.f32.mrf.mxu1  ;;  %v1037_v46 = vpop.f32.mrf.mxu0  ;;  %2075 = vmatpush.msrb.mxu1 %v4940_v21 }
 0x137   : > { %v901_v7 = vadd.f32 %v900_v60, %v842_v8  ;;  %v959_v38 = vpop.f32.mrf.mxu2  ;;  %2034 = vmatpush.msrb.mxu0 %v1854_v61  ;;  %v226_v61 = vld [vmem:[%s6071_s1] sm:$0xff] }
 0x138   : > { %2077 = vmatpush.msrb.mxu1 %v4961_v44  ;;  %v5063_v59 = vand.u32 4294901760, %v226_v61 }
 0x139   : > { %v960_v34 = vadd.f32 %v959_v38, %v901_v7  ;;  %1567 = vmatmul.f32.gmra.mxu0 %v4563_v28  ;;  %1619 = vmatmul.f32.gmra.mxu1 %v4540_v11 }
 0x13a   : > { %1733 = vmatmul.f32.gmra.mxu3 %v4544_v58  ;;  %2079 = vmatpush.msrb.mxu1 %v4982_v26  ;;  %v5069_v14 = vsub.f32 %v226_v61, %v5063_v59 }
 0x13b   : > { %v5048_v39 = vadd.f32 %v1006_v16, %v960_v34  ;;  %1686 = vmatmul.f32.gmra.mxu2 %v4544_v58 }
 0x13c   : > { %2081 = vmatpush.msrb.mxu1 %v4997_v40  ;;  %2143 = vmatpush.msrb.mxu2 %v5063_v59  ;;  %v5075_v60 = vand.u32 4294901760, %v5069_v14 }
 0x13d   : > { %v1236_v23 = vpop.f32.mrf.mxu3 }
 0x13e   : > { %v1045_v21 = vpop.f32.mrf.mxu0  ;;  %v1128_v45 = vpop.f32.mrf.mxu1 }
 0x13f   : > { %v1129_v48 = vadd.f32 %v1128_v45, %v1037_v46  ;;  %v1182_v35 = vpop.f32.mrf.mxu2 }
 0x141   : > { %v1183_v22 = vadd.f32 %v1182_v35, %v1129_v48  ;;  %1572 = vmatmul.f32.gmra.mxu0 %v4594_v19  ;;  %1625 = vmatmul.f32.gmra.mxu1 %v4575_v43 }
 0x142   : > { %1737 = vmatmul.f32.gmra.mxu3 %v4577_v31 }
 0x143   : > { %1690 = vmatmul.f32.gmra.mxu2 %v4577_v31  ;;  %v5058_v44 = vadd.f32 %v1236_v23, %v1183_v22 }
 0x145   : > { %v1242_v26 = vpop.f32.mrf.mxu3 }
 0x146   : > { %v1053_v51 = vpop.f32.mrf.mxu0  ;;  %v1132_v40 = vpop.f32.mrf.mxu1 }
 0x147   : > { %v1133_v62 = vadd.f32 %v1132_v40, %v1045_v21  ;;  %v1187_v8 = vpop.f32.mrf.mxu2 }
 0x149   : > { %v1188_v16 = vadd.f32 %v1187_v8, %v1133_v62  ;;  %1631 = vmatmul.f32.gmra.mxu1 %v4606_v33  ;;  %1768 = vmatmul.f32.vlgmr.msra.gmra.mxu0 %v4425_v53  ;;  %v2216_v53 = vsub.f32 %v5069_v14, %v5075_v60  ;;  %v574_v8 = vadd.f32 %v4839_v29, %v4772_v27 }
 0x14a   : > { %1967 = vmatmul.f32.vlgmr.msra.gmra.mxu3 %v4335_v20  ;;  %2260 = vmatpush.msra.mxu0 %v5023_v13 }
 0x14b   : > { %1913 = vmatmul.f32.vlgmr.msra.gmra.mxu2 %v4281_v5  ;;  %v5077_v46 = vadd.f32 %v1242_v26, %v1188_v16  ;;  %v5084_v5 = vand.u32 4294901760, %v2216_v53 }
 0x14c   : > { %2367 = vmatpush.msra.mxu2 %v5030_v15  ;;  %2263 = vmatpush.msra.mxu0 %v5069_v14 }
 0x14d   : > { %v1248_v0 = vpop.f32.mrf.mxu3  ;;  %2218 = vmatpush.msrb.mxu3 %v5084_v5 }
 0x14e   : > { %v1061_v7 = vpop.f32.mrf.mxu0  ;;  %v1136_v38 = vpop.f32.mrf.mxu1  ;;  %2371 = vmatpush.msra.mxu2 %v5075_v60 }
 0x14f   : > { %v1137_v20 = vadd.f32 %v1136_v38, %v1053_v51  ;;  %v1192_v34 = vpop.f32.mrf.mxu2  ;;  %2412 = vmatpush.msra.mxu3 %v5015_v42 }
 0x151   : > { %v1193_v23 = vadd.f32 %v1192_v34, %v1137_v20  ;;  %1776 = vmatmul.f32.gmra.mxu0 %v4486_v54  ;;  %1859 = vmatmul.f32.vlgmr.msra.gmra.mxu1 %v4274_v2 }
 0x152   : > { %1973 = vmatmul.f32.gmra.mxu3 %v4431_v55  ;;  %2310 = vmatpush.msra.mxu1 %v5015_v42 }
 0x153   : > { %1918 = vmatmul.f32.gmra.mxu2 %v4385_v36  ;;  %v5092_v21 = vadd.f32 %v1248_v0, %v1193_v23  ;;  %2414 = vmatpush.msra.mxu3 %v5063_v59 }
 0x154   : > { %2312 = vmatpush.msra.mxu1 %v5063_v59 }
 0x155   : > { %v1254_v45 = vpop.f32.mrf.mxu3 }
 0x156   : > { %v1069_v48 = vpop.f32.mrf.mxu0  ;;  %v1140_v35 = vpop.f32.mrf.mxu1 }
 0x157   : > { %v1141_v54 = vadd.f32 %v1140_v35, %v1061_v7  ;;  %v1197_v22 = vpop.f32.mrf.mxu2 }
 0x159   : > { %v1198_v55 = vadd.f32 %v1197_v22, %v1141_v54  ;;  %1784 = vmatmul.f32.gmra.mxu0 %v4537_v47  ;;  %1863 = vmatmul.f32.gmra.mxu1 %v4305_v10  ;;  %v621_v47 = vadd.f32 %v4850_v18, %v574_v8 }
 0x15a   : > { %1979 = vmatmul.f32.gmra.mxu3 %v4491_v30 }
 0x15b   : > { %1923 = vmatmul.f32.gmra.mxu2 %v4469_v6  ;;  %v5101_v36 = vadd.f32 %v1254_v45, %v1198_v55  ;;  %v2109_v0 = vsel %vm2107_vm1, %v621_v47, 0  ;;  %v6106_v47 = vld [vmem:[#allocation5_spill] sm:$0xff] }
 0x15c   : > { %v5117_v38 = vand.u32 4294901760, %v2109_v0 }
 0x15d   : > { %v1260_v26 = vpop.f32.mrf.mxu3 }
 0x15e   : > { %v1077_v61 = vpop.f32.mrf.mxu0  ;;  %v1144_v51 = vpop.f32.mrf.mxu1  ;;  %v5127_v20 = vsub.f32 %v2109_v0, %v5117_v38 }
 0x15f   : > { %v1145_v40 = vadd.f32 %v1144_v51, %v1069_v48  ;;  %v1202_v62 = vpop.f32.mrf.mxu2 }
 0x161   : > { %v1203_v16 = vadd.f32 %v1202_v62, %v1145_v40  ;;  %1792 = vmatmul.f32.gmra.mxu0 %v4572_v17  ;;  %1867 = vmatmul.f32.gmra.mxu1 %v4422_v52  ;;  %v578_v17 = vadd.f32 %v4848_v24, %v4789_v63 }
 0x162   : > { %1985 = vmatmul.f32.gmra.mxu3 %v4540_v11 }
 0x163   : > { %1928 = vmatmul.f32.gmra.mxu2 %v4521_v32  ;;  %v5110_v6 = vadd.f32 %v1260_v26, %v1203_v16  ;;  %v625_v32 = vadd.f32 %v4860_v49, %v578_v17  ;;  %v582_v49 = vadd.f32 %v4858_v1, %v4808_v56 }
 0x165   : > { %v1266_v30 = vpop.f32.mrf.mxu3  ;;  %v2112_v63 = vsel %vm2107_vm1, %v625_v32, 0  ;;  %v629_v48 = vadd.f32 %v4870_v9, %v582_v49 }
 0x166   : > { %v1148_v53 = vpop.f32.mrf.mxu1  ;;  %v5113_v7 = vpop.f32.mrf.mxu0 }
 0x167   : > { %v1149_v27 = vadd.f32 %v1148_v53, %v1077_v61  ;;  %v1207_v29 = vpop.f32.mrf.mxu2  ;;  %v2115_v54 = vsel %vm2107_vm1, %v629_v48, 0 }
 0x168   : > { %v5161_v26 = vand.u32 4294901760, %v2115_v54 }
 0x169   : > { %v1208_v18 = vadd.f32 %v1207_v29, %v1149_v27  ;;  %1800 = vmatmul.f32.gmra.mxu0 %v4603_v25  ;;  %1871 = vmatmul.f32.gmra.mxu1 %v4493_v57 }
 0x16a   : > { %1991 = vmatmul.f32.gmra.mxu3 %v4575_v43  ;;  %v5139_v43 = vand.u32 4294901760, %v2112_v63 }
 0x16b   : > { %1933 = vmatmul.f32.gmra.mxu2 %v4563_v28  ;;  %v5124_v11 = vadd.f32 %v1266_v30, %v1208_v18  ;;  %v2146_v28 = vand.u32 4294901760, %v5127_v20  ;;  %v6107_v30 = vld [vmem:[#allocation7_spill] sm:$0xff]  ;;  %v6108_v18 = vld [vmem:[#allocation9_spill] sm:$0xff] }
 0x16c   : > { %v5150_v1 = vsub.f32 %v2112_v63, %v5139_v43  ;;  %v590_v0 = vadd.f32 %v6107_v30, %v6106_v47 }
 0x16d   : > { %v1494_v34 = vpop.f32.mrf.mxu3  ;;  %v2147_v56 = vsub.f32 %v5127_v20, %v2146_v28 }
 0x16e   : > { %v5130_v24 = vpop.f32.mrf.mxu0  ;;  %v5132_v23 = vpop.f32.mrf.mxu1  ;;  %v6083_v61 = vand.u32 4294901760, %v5150_v1  ;;  %v637_v32 = vadd.f32 %v6108_v18, %v590_v0 }
 0x16f   : > { %v1403_v25 = vpop.f32.mrf.mxu2 }
 0x170   : > { %v5136_v45 = vadd.f32 %v1494_v34, %v1403_v25  ;;  %v2155_v40 = vsub.f32 %v5150_v1, %v6083_v61  ;;  %v2121_v25 = vsel %vm2107_vm1, %v637_v32, 0 }
 0x171   : > { %1808 = vmatmul.f32.gmra.mxu0 %v4629_v37  ;;  %1875 = vmatmul.f32.gmra.mxu1 %v4544_v58 }
 0x172   : > { %1997 = vmatmul.f32.gmra.mxu3 %v4606_v33  ;;  %v586_v33 = vadd.f32 %v4868_v3, %v4823_v50  ;;  %v5173_v50 = vsub.f32 %v2115_v54, %v5161_v26  ;;  %v2156_v29 = vand.u32 4294901760, %v2155_v40  ;;  %v6110_v54 = vld [vmem:[#allocation8_spill] sm:$0xff]  ;;  %v6111_v40 = vld [vmem:[#allocation10_spill] sm:$0xff] }
 0x173   : > { %1938 = vmatmul.f32.gmra.mxu2 %v4594_v19  ;;  %v2148_v19 = vand.u32 4294901760, %v2147_v56 }
 0x174   : > { %v633_v51 = vadd.f32 %v4880_v4, %v586_v33  ;;  %v6082_v17 = vand.u32 4294901760, %v5173_v50 }
 0x175   : > { %v1498_v35 = vpop.f32.mrf.mxu3 }
 0x176   : > { %v5153_v22 = vpop.f32.mrf.mxu0  ;;  %v5155_v37 = vpop.f32.mrf.mxu1  ;;  %v2118_v4 = vsel %vm2107_vm1, %v633_v51, 0 }
 0x177   : > { %v1411_v55 = vpop.f32.mrf.mxu2  ;;  %v5189_v27 = vand.u32 4294901760, %v2118_v4 }
 0x178   : > { %v5159_v9 = vadd.f32 %v1498_v35, %v1411_v55  ;;  %v6109_v35 = vld [vmem:[#allocation6_spill] sm:$0xff] }
 0x179   : > { %1879 = vmatmul.f32.gmra.mxu1 %v4577_v31  ;;  %2036 = vmatmul.f32.vlgmr.msrb.gmra.mxu0 %v4274_v2  ;;  %v5199_v34 = vsub.f32 %v2118_v4, %v5189_v27  ;;  %v594_v55 = vadd.f32 %v6110_v54, %v6109_v35 }
 0x17a   : > { %2220 = vmatmul.f32.vlgmr.msrb.gmra.mxu3 %v5117_v38  ;;  %2473 = vmatpush.msrb.mxu0 %v5015_v42 }
 0x17b   : > { %2149 = vmatmul.f32.vlgmr.msrb.gmra.mxu2 %v2148_v19  ;;  %2642 = vmatpush.msrb.mxu3 %v5015_v42  ;;  %v5213_v19 = vand.u32 4294901760, %v2121_v25  ;;  %v641_v4 = vadd.f32 %v6111_v40, %v594_v55 }
 0x17c   : > { %2592 = vmatpush.msrb.mxu2 %v5023_v13  ;;  %2475 = vmatpush.msrb.mxu0 %v5063_v59 }
 0x17d   : > { %v1502_v3 = vpop.f32.mrf.mxu3  ;;  %2644 = vmatpush.msrb.mxu3 %v5063_v59  ;;  %v2124_v0 = vsel %vm2107_vm1, %v641_v4, 0 }
 0x17e   : > { %v5180_v62 = vpop.f32.mrf.mxu0  ;;  %v5182_v8 = vpop.f32.mrf.mxu1  ;;  %2595 = vmatpush.msrb.mxu2 %v5069_v14 }
 0x17f   : > { %v1419_v16 = vpop.f32.mrf.mxu2 }
 0x180   : > { %v5187_v53 = vadd.f32 %v1502_v3, %v1419_v16  ;;  %v6080_v3 = vand.u32 4294901760, %v5199_v34  ;;  %v5221_v16 = vsub.f32 %v2121_v25, %v5213_v19 }
 0x181   : > { %2040 = vmatmul.f32.gmra.mxu0 %v4305_v10  ;;  %2083 = vmatmul.f32.vlgmr.msrb.gmra.mxu1 %v4274_v2  ;;  %v2163_v2 = vsub.f32 %v5173_v50, %v6082_v17 }
 0x182   : > { %2224 = vmatmul.f32.gmra.mxu3 %v5139_v43  ;;  %2544 = vmatpush.msrb.mxu1 %v5041_v12  ;;  %v2171_v30 = vsub.f32 %v5199_v34, %v6080_v3  ;;  %v6079_v25 = vand.u32 4294901760, %v5221_v16 }
 0x183   : > { %2157 = vmatmul.f32.gmra.mxu2 %v2156_v29  ;;  %v2164_v51 = vand.u32 4294901760, %v2163_v2 }
 0x184   : > { %2550 = vmatpush.msrb.mxu1 %v5084_v5  ;;  %v2172_v2 = vand.u32 4294901760, %v2171_v30  ;;  %v2179_v54 = vsub.f32 %v5221_v16, %v6079_v25 }
 0x185   : > { %v1506_v63 = vpop.f32.mrf.mxu3 }
 0x186   : > { %v5205_v49 = vpop.f32.mrf.mxu0  ;;  %v5207_v48 = vpop.f32.mrf.mxu1 }
 0x187   : > { %v1427_v56 = vpop.f32.mrf.mxu2 }
 0x188   : > { %v5211_v33 = vadd.f32 %v1506_v63, %v1427_v56  ;;  %v5233_v63 = vand.u32 4294901760, %v2124_v0 }
 0x189   : > { %2044 = vmatmul.f32.gmra.mxu0 %v4422_v52  ;;  %2087 = vmatmul.f32.gmra.mxu1 %v4305_v10 }
 0x18a   : > { %2228 = vmatmul.f32.gmra.mxu3 %v5161_v26  ;;  %v5240_v56 = vsub.f32 %v2124_v0, %v5233_v63 }
 0x18b   : > { %2165 = vmatmul.f32.gmra.mxu2 %v2164_v51 }
 0x18d   : > { %v1510_v47 = vpop.f32.mrf.mxu3 }
 0x18e   : > { %v5227_v29 = vpop.f32.mrf.mxu0  ;;  %v5229_v10 = vpop.f32.mrf.mxu1 }
 0x18f   : > { %v1435_v18 = vpop.f32.mrf.mxu2 }
 0x190   : > { %v5231_v32 = vadd.f32 %v1510_v47, %v1435_v18  ;;  %v6081_v47 = vand.u32 4294901760, %v5240_v56 }
 0x191   : > { %2048 = vmatmul.f32.gmra.mxu0 %v4493_v57  ;;  %2091 = vmatmul.f32.gmra.mxu1 %v4422_v52  ;;  %v2180_v52 = vand.u32 4294901760, %v2179_v54 }
 0x192   : > { %2232 = vmatmul.f32.gmra.mxu3 %v5189_v27  ;;  %v2187_v18 = vsub.f32 %v5240_v56, %v6081_v47 }
 0x193   : > { %2173 = vmatmul.f32.gmra.mxu2 %v2172_v2 }
 0x195   : > { %v1514_v35 = vpop.f32.mrf.mxu3 }
 0x196   : > { %v5245_v55 = vpop.f32.mrf.mxu1  ;;  %v1548_v51 = vpop.f32.mrf.mxu0 }
 0x197   : > { %v1443_v40 = vpop.f32.mrf.mxu2  ;;  %v1549_v30 = vadd.f32 %v1548_v51, %v5136_v45 }
 0x198   : > { %v5247_v4 = vadd.f32 %v1514_v35, %v1443_v40 }
 0x199   : > { %2052 = vmatmul.f32.gmra.mxu0 %v4544_v58  ;;  %2095 = vmatmul.f32.gmra.mxu1 %v4493_v57  ;;  %v2188_v57 = vand.u32 4294901760, %v2187_v18 }
 0x19a   : > { %2236 = vmatmul.f32.gmra.mxu3 %v5213_v19 }
 0x19b   : > { %2181 = vmatmul.f32.gmra.mxu2 %v2180_v52 }
 0x19d   : > { %v1718_v0 = vpop.f32.mrf.mxu3 }
 0x19e   : > { %v1553_v2 = vpop.f32.mrf.mxu0  ;;  %v1602_v35 = vpop.f32.mrf.mxu1 }
 0x19f   : > { %v1603_v40 = vadd.f32 %v1602_v35, %v1549_v30  ;;  %v1671_v25 = vpop.f32.mrf.mxu2  ;;  %v1554_v45 = vadd.f32 %v1553_v2, %v5159_v9 }
 0x1a1   : > { %v1672_v3 = vadd.f32 %v1671_v25, %v1603_v40  ;;  %2056 = vmatmul.f32.gmra.mxu0 %v4577_v31  ;;  %2099 = vmatmul.f32.gmra.mxu1 %v4544_v58 }
 0x1a2   : > { %2240 = vmatmul.f32.gmra.mxu3 %v5233_v63 }
 0x1a3   : > { %v5260_v54 = vadd.f32 %v1718_v0, %v1672_v3  ;;  %2189 = vmatmul.f32.gmra.mxu2 %v2188_v57 }
 0x1a5   : > { %v1722_v51 = vpop.f32.mrf.mxu3 }
 0x1a6   : > { %v1558_v52 = vpop.f32.mrf.mxu0  ;;  %v1608_v47 = vpop.f32.mrf.mxu1 }
 0x1a7   : > { %v1609_v17 = vadd.f32 %v1608_v47, %v1554_v45  ;;  %v1675_v61 = vpop.f32.mrf.mxu2  ;;  %v1559_v9 = vadd.f32 %v1558_v52, %v5187_v53 }
 0x1a9   : > { %v1676_v30 = vadd.f32 %v1675_v61, %v1609_v17  ;;  %2103 = vmatmul.f32.gmra.mxu1 %v4577_v31  ;;  %2266 = vmatmul.f32.vlgmr.msra.gmra.mxu0 %v5127_v20  ;;  %v6112_v20 = vand.u32 4294901760, %v5150_v1 }
 0x1aa   : > { %2416 = vmatmul.f32.vlgmr.msra.gmra.mxu3 %v5117_v38  ;;  %2699 = vmatpush.msra.mxu0 %v5030_v15 }
 0x1ab   : > { %v5267_v58 = vadd.f32 %v1722_v51, %v1676_v30  ;;  %2373 = vmatmul.f32.vlgmr.msra.gmra.mxu2 %v5117_v38  ;;  %2876 = vmatpush.msra.mxu3 %v5041_v12 }
 0x1ac   : > { %2805 = vmatpush.msra.mxu2 %v5015_v42  ;;  %2703 = vmatpush.msra.mxu0 %v5075_v60 }
 0x1ad   : > { %v1726_v61 = vpop.f32.mrf.mxu3  ;;  %2882 = vmatpush.msra.mxu3 %v5084_v5 }
 0x1ae   : > { %v1563_v31 = vpop.f32.mrf.mxu0  ;;  %v1614_v17 = vpop.f32.mrf.mxu1  ;;  %2807 = vmatpush.msra.mxu2 %v5063_v59 }
 0x1af   : > { %v1615_v3 = vadd.f32 %v1614_v17, %v1559_v9  ;;  %v1679_v25 = vpop.f32.mrf.mxu2  ;;  %v1564_v53 = vadd.f32 %v1563_v31, %v5211_v33 }
 0x1b1   : > { %v1680_v47 = vadd.f32 %v1679_v25, %v1615_v3  ;;  %2271 = vmatmul.f32.gmra.mxu0 %v5150_v1  ;;  %2316 = vmatmul.f32.vlgmr.msra.gmra.mxu1 %v2146_v28 }
 0x1b2   : > { %2420 = vmatmul.f32.gmra.mxu3 %v5139_v43  ;;  %2744 = vmatpush.msra.mxu1 %v5015_v42 }
 0x1b3   : > { %v5281_v38 = vadd.f32 %v1726_v61, %v1680_v47  ;;  %2377 = vmatmul.f32.gmra.mxu2 %v5139_v43  ;;  %v6113_v61 = vand.u32 4294901760, %v5173_v50 }
 0x1b4   : > { %2746 = vmatpush.msra.mxu1 %v5063_v59 }
 0x1b5   : > { %v1730_v0 = vpop.f32.mrf.mxu3 }
 0x1b6   : > { %v1568_v18 = vpop.f32.mrf.mxu0  ;;  %v1620_v2 = vpop.f32.mrf.mxu1 }
 0x1b7   : > { %v1621_v35 = vadd.f32 %v1620_v2, %v1564_v53  ;;  %v1683_v40 = vpop.f32.mrf.mxu2  ;;  %v1569_v43 = vadd.f32 %v1568_v18, %v5231_v32  ;;  %v6115_v18 = vand.u32 4294901760, %v5199_v34 }
 0x1b9   : > { %v1684_v57 = vadd.f32 %v1683_v40, %v1621_v35  ;;  %2276 = vmatmul.f32.gmra.mxu0 %v5173_v50  ;;  %2322 = vmatmul.f32.gmra.mxu1 %v6112_v20 }
 0x1ba   : > { %2424 = vmatmul.f32.gmra.mxu3 %v5161_v26 }
 0x1bb   : > { %v5290_v28 = vadd.f32 %v1730_v0, %v1684_v57  ;;  %2381 = vmatmul.f32.gmra.mxu2 %v5161_v26  ;;  %v6114_v26 = vld [vmem:[#allocation11_spill] sm:$0xff] }
 0x1bc   : > { %v2441_v32 = vsel %vm2107_vm1, %v6114_v26, 0 }
 0x1bd   : > { %v1734_v33 = vpop.f32.mrf.mxu3  ;;  %v5304_v47 = vand.u32 4294901760, %v2441_v32 }
 0x1be   : > { %v1573_v45 = vpop.f32.mrf.mxu0  ;;  %v1626_v51 = vpop.f32.mrf.mxu1 }
 0x1bf   : > { %v1627_v52 = vadd.f32 %v1626_v51, %v1569_v43  ;;  %v1687_v30 = vpop.f32.mrf.mxu2  ;;  %v1574_v31 = vadd.f32 %v1573_v45, %v5247_v4  ;;  %v6116_v4 = vld [vmem:[#allocation12_spill] sm:$0xff] }
 0x1c0   : > { %v2444_v35 = vsel %vm2107_vm1, %v6116_v4, 0 }
 0x1c1   : > { %v1688_v9 = vadd.f32 %v1687_v30, %v1627_v52  ;;  %2281 = vmatmul.f32.gmra.mxu0 %v5199_v34  ;;  %2328 = vmatmul.f32.gmra.mxu1 %v6113_v61  ;;  %v6117_v52 = vand.u32 4294901760, %v5221_v16  ;;  %v6118_v61 = vld [vmem:[#allocation13_spill] sm:$0xff] }
 0x1c2   : > { %2428 = vmatmul.f32.gmra.mxu3 %v5189_v27  ;;  %v2447_v26 = vsel %vm2107_vm1, %v6118_v61, 0 }
 0x1c3   : > { %v5298_v1 = vadd.f32 %v1734_v33, %v1688_v9  ;;  %2385 = vmatmul.f32.gmra.mxu2 %v5189_v27  ;;  %v2477_v27 = vsub.f32 %v2441_v32, %v5304_v47  ;;  %v5316_v33 = vand.u32 4294901760, %v2444_v35 }
 0x1c5   : > { %v1738_v17 = vpop.f32.mrf.mxu3  ;;  %v2478_v43 = vand.u32 4294901760, %v2477_v27  ;;  %v2485_v30 = vsub.f32 %v2444_v35, %v5316_v33 }
 0x1c6   : > { %v1632_v3 = vpop.f32.mrf.mxu1  ;;  %v1769_v25 = vpop.f32.mrf.mxu0 }
 0x1c7   : > { %v1633_v53 = vadd.f32 %v1632_v3, %v1574_v31  ;;  %v1691_v0 = vpop.f32.mrf.mxu2 }
 0x1c9   : > { %v1692_v50 = vadd.f32 %v1691_v0, %v1633_v53  ;;  %2286 = vmatmul.f32.gmra.mxu0 %v5221_v16  ;;  %2334 = vmatmul.f32.gmra.mxu1 %v6115_v18  ;;  %v2486_v0 = vand.u32 4294901760, %v2485_v30  ;;  %v6119_v18 = vand.u32 4294901760, %v5240_v56 }
 0x1ca   : > { %2432 = vmatmul.f32.gmra.mxu3 %v5213_v19 }
 0x1cb   : > { %v5311_v2 = vadd.f32 %v1738_v17, %v1692_v50  ;;  %2389 = vmatmul.f32.gmra.mxu2 %v5213_v19  ;;  %v2479_v19 = vsub.f32 %v2477_v27, %v2478_v43  ;;  %v2487_v4 = vsub.f32 %v2485_v30, %v2486_v0 }
 0x1cd   : > { %v1968_v40 = vpop.f32.mrf.mxu3  ;;  %v2480_v3 = vand.u32 4294901760, %v2479_v19 }
 0x1ce   : > { %v1777_v57 = vpop.f32.mrf.mxu0  ;;  %v1860_v20 = vpop.f32.mrf.mxu1 }
 0x1cf   : > { %v1861_v45 = vadd.f32 %v1860_v20, %v1769_v25  ;;  %v1914_v34 = vpop.f32.mrf.mxu2  ;;  %v5328_v25 = vand.u32 4294901760, %v2447_v26 }
 0x1d1   : > { %v1915_v51 = vadd.f32 %v1914_v34, %v1861_v45  ;;  %2291 = vmatmul.f32.gmra.mxu0 %v5240_v56  ;;  %2340 = vmatmul.f32.gmra.mxu1 %v6117_v52 }
 0x1d2   : > { %2436 = vmatmul.f32.gmra.mxu3 %v5233_v63 }
 0x1d3   : > { %2393 = vmatmul.f32.gmra.mxu2 %v5233_v63  ;;  %v5324_v9 = vadd.f32 %v1968_v40, %v1915_v51  ;;  %v2493_v63 = vsub.f32 %v2447_v26, %v5328_v25  ;;  %v6120_v40 = vld [vmem:[#allocation14_spill] sm:$0xff]  ;;  %v2488_v51 = vand.u32 4294901760, %v2487_v4 }
 0x1d5   : > { %v1974_v32 = vpop.f32.mrf.mxu3  ;;  %v2494_v52 = vand.u32 4294901760, %v2493_v63 }
 0x1d6   : > { %v1785_v31 = vpop.f32.mrf.mxu0  ;;  %v1864_v17 = vpop.f32.mrf.mxu1 }
 0x1d7   : > { %v1865_v16 = vadd.f32 %v1864_v17, %v1777_v57  ;;  %v1919_v53 = vpop.f32.mrf.mxu2  ;;  %v2450_v57 = vsel %vm2107_vm1, %v6120_v40, 0  ;;  %v2495_v26 = vsub.f32 %v2493_v63, %v2494_v52  ;;  %v2453_v17 = vsel %vm2107_vm1, %v5026_v41, 0 }
 0x1d9   : > { %v1920_v50 = vadd.f32 %v1919_v53, %v1865_v16  ;;  %2346 = vmatmul.f32.gmra.mxu1 %v6119_v18  ;;  %2481 = vmatmul.f32.vlgmr.msrb.gmra.mxu0 %v2480_v3  ;;  %v5353_v53 = vand.u32 4294901760, %v2453_v17  ;;  %v2496_v18 = vand.u32 4294901760, %v2495_v26 }
 0x1da   : > { %2648 = vmatmul.f32.vlgmr.msrb.gmra.mxu3 %v2478_v43  ;;  %2924 = vmatpush.msrb.mxu0 %v5023_v13 }
 0x1db   : > { %2598 = vmatmul.f32.vlgmr.msrb.gmra.mxu2 %v2477_v27  ;;  %v5334_v35 = vadd.f32 %v1974_v32, %v1920_v50  ;;  %3076 = vmatpush.msrb.mxu3 %v5015_v42  ;;  %v5343_v27 = vand.u32 4294901760, %v2450_v57 }
 0x1dc   : > { %3031 = vmatpush.msrb.mxu2 %v5030_v15  ;;  %2927 = vmatpush.msrb.mxu0 %v5069_v14 }
 0x1dd   : > { %v1980_v56 = vpop.f32.mrf.mxu3  ;;  %3078 = vmatpush.msrb.mxu3 %v5063_v59  ;;  %v2501_v61 = vsub.f32 %v2450_v57, %v5343_v27 }
 0x1de   : > { %v1793_v20 = vpop.f32.mrf.mxu0  ;;  %v1868_v43 = vpop.f32.mrf.mxu1  ;;  %3035 = vmatpush.msrb.mxu2 %v5075_v60 }
 0x1df   : > { %v1869_v45 = vadd.f32 %v1868_v43, %v1785_v31  ;;  %v1924_v34 = vpop.f32.mrf.mxu2  ;;  %v2502_v4 = vand.u32 4294901760, %v2501_v61 }
 0x1e1   : > { %v1925_v19 = vadd.f32 %v1924_v34, %v1869_v45  ;;  %2489 = vmatmul.f32.gmra.mxu0 %v2488_v51  ;;  %2552 = vmatmul.f32.vlgmr.msrb.gmra.mxu1 %v5304_v47  ;;  %v2503_v41 = vsub.f32 %v2501_v61, %v2502_v4 }
 0x1e2   : > { %2654 = vmatmul.f32.gmra.mxu3 %v2486_v0  ;;  %2974 = vmatpush.msrb.mxu1 %v5015_v42 }
 0x1e3   : > { %2603 = vmatmul.f32.gmra.mxu2 %v2485_v30  ;;  %v5348_v32 = vadd.f32 %v1980_v56, %v1925_v19  ;;  %v2509_v30 = vsub.f32 %v2453_v17, %v5353_v53  ;;  %v2456_v56 = vsel %vm2107_vm1, %v5048_v39, 0  ;;  %v2504_v26 = vand.u32 4294901760, %v2503_v41 }
 0x1e4   : > { %2976 = vmatpush.msrb.mxu1 %v5063_v59  ;;  %v5361_v34 = vand.u32 4294901760, %v2456_v56 }
 0x1e5   : > { %v1986_v31 = vpop.f32.mrf.mxu3 }
 0x1e6   : > { %v1801_v3 = vpop.f32.mrf.mxu0  ;;  %v1872_v16 = vpop.f32.mrf.mxu1  ;;  %v2517_v39 = vsub.f32 %v2456_v56, %v5361_v34 }
 0x1e7   : > { %v1873_v50 = vadd.f32 %v1872_v16, %v1793_v20  ;;  %v1929_v0 = vpop.f32.mrf.mxu2  ;;  %v2510_v16 = vand.u32 4294901760, %v2509_v30 }
 0x1e9   : > { %v1930_v40 = vadd.f32 %v1929_v0, %v1873_v50  ;;  %2497 = vmatmul.f32.gmra.mxu0 %v2496_v18  ;;  %2556 = vmatmul.f32.gmra.mxu1 %v5316_v33 }
 0x1ea   : > { %2660 = vmatmul.f32.gmra.mxu3 %v2494_v52  ;;  %v1306_v52 = vadd.f32 %v5113_v7, %v5058_v44 }
 0x1eb   : > { %2608 = vmatmul.f32.gmra.mxu2 %v2493_v63  ;;  %v5357_v57 = vadd.f32 %v1986_v31, %v1930_v40  ;;  %v2511_v31 = vsub.f32 %v2509_v30, %v2510_v16 }
 0x1ec   : > { %v1353_v63 = vadd.f32 %v5132_v23, %v1306_v52  ;;  %v1310_v23 = vadd.f32 %v5130_v24, %v5077_v46 }
 0x1ed   : > { %v1992_v43 = vpop.f32.mrf.mxu3  ;;  %v2512_v41 = vand.u32 4294901760, %v2511_v31 }
 0x1ee   : > { %v1809_v45 = vpop.f32.mrf.mxu0  ;;  %v1876_v20 = vpop.f32.mrf.mxu1  ;;  %v2773_v0 = vsel %vm2107_vm1, %v1353_v63, 0 }
 0x1ef   : > { %v1877_v51 = vadd.f32 %v1876_v20, %v1801_v3  ;;  %v1934_v19 = vpop.f32.mrf.mxu2  ;;  %v2518_v20 = vand.u32 4294901760, %v2517_v39 }
 0x1f1   : > { %v1935_v17 = vadd.f32 %v1934_v19, %v1877_v51  ;;  %2505 = vmatmul.f32.gmra.mxu0 %v2504_v26  ;;  %2560 = vmatmul.f32.gmra.mxu1 %v5328_v25 }
 0x1f2   : > { %2666 = vmatmul.f32.gmra.mxu3 %v2502_v4  ;;  %v5375_v4 = vand.u32 4294901760, %v2773_v0 }
 0x1f3   : > { %2613 = vmatmul.f32.gmra.mxu2 %v2501_v61  ;;  %v5368_v50 = vadd.f32 %v1992_v43, %v1935_v17  ;;  %v1357_v61 = vadd.f32 %v5155_v37, %v1310_v23  ;;  %v2519_v43 = vsub.f32 %v2517_v39, %v2518_v20  ;;  %v1314_v37 = vadd.f32 %v5153_v22, %v5092_v21 }
 0x1f5   : > { %v1998_v3 = vpop.f32.mrf.mxu3  ;;  %v2776_v26 = vsel %vm2107_vm1, %v1357_v61, 0  ;;  %v2520_v17 = vand.u32 4294901760, %v2519_v43  ;;  %v1361_v31 = vadd.f32 %v5182_v8, %v1314_v37  ;;  %v1318_v8 = vadd.f32 %v5180_v62, %v5101_v36 }
 0x1f6   : > { %v1880_v18 = vpop.f32.mrf.mxu1  ;;  %v5371_v40 = vpop.f32.mrf.mxu0  ;;  %v5394_v63 = vand.u32 4294901760, %v2776_v26 }
 0x1f7   : > { %v1881_v44 = vadd.f32 %v1880_v18, %v1809_v45  ;;  %v1939_v7 = vpop.f32.mrf.mxu2  ;;  %v5382_v45 = vsub.f32 %v2773_v0, %v5375_v4  ;;  %v2779_v22 = vsel %vm2107_vm1, %v1361_v31, 0 }
 0x1f8   : > { %v5402_v0 = vsub.f32 %v2776_v26, %v5394_v63 }
 0x1f9   : > { %v1940_v56 = vadd.f32 %v1939_v7, %v1881_v44  ;;  %2513 = vmatmul.f32.gmra.mxu0 %v2512_v41  ;;  %2564 = vmatmul.f32.gmra.mxu1 %v5343_v27 }
 0x1fa   : > { %2672 = vmatmul.f32.gmra.mxu3 %v2510_v16  ;;  %v6087_v23 = vand.u32 4294901760, %v5402_v0 }
 0x1fb   : > { %2618 = vmatmul.f32.gmra.mxu2 %v2509_v30  ;;  %v5379_v51 = vadd.f32 %v1998_v3, %v1940_v56  ;;  %v6088_v30 = vand.u32 4294901760, %v5382_v45  ;;  %v1365_v56 = vadd.f32 %v5207_v48, %v1318_v8 }
 0x1fc   : > { %v2819_v61 = vsub.f32 %v5402_v0, %v6087_v23 }
 0x1fd   : > { %6121 = vst [vmem:[#allocation5_spill] sm:$0xff] %v5379_v51  ;;  %v2221_v19 = vpop.f32.mrf.mxu3  ;;  %v2811_v3 = vsub.f32 %v5382_v45, %v6088_v30  ;;  %v2782_v48 = vsel %vm2107_vm1, %v1365_v56, 0 }
 0x1fe   : > { %v5385_v46 = vpop.f32.mrf.mxu0  ;;  %v5387_v24 = vpop.f32.mrf.mxu1  ;;  %v5441_v37 = vand.u32 4294901760, %v2782_v48  ;;  %v2820_v31 = vand.u32 4294901760, %v2819_v61 }
 0x1ff   : > { %v2150_v52 = vpop.f32.mrf.mxu2 }
 0x200   : > { %v5391_v16 = vadd.f32 %v2221_v19, %v2150_v52  ;;  %v1322_v52 = vadd.f32 %v5205_v49, %v5110_v6  ;;  %v5451_v6 = vsub.f32 %v2782_v48, %v5441_v37 }
 0x201   : > { %2521 = vmatmul.f32.gmra.mxu0 %v2520_v17  ;;  %2568 = vmatmul.f32.gmra.mxu1 %v5353_v53 }
 0x202   : > { %2678 = vmatmul.f32.gmra.mxu3 %v2518_v20  ;;  %v5413_v20 = vand.u32 4294901760, %v2779_v22  ;;  %v6084_v48 = vand.u32 4294901760, %v5451_v6 }
 0x203   : > { %2623 = vmatmul.f32.gmra.mxu2 %v2517_v39  ;;  %v2812_v39 = vand.u32 4294901760, %v2811_v3 }
 0x204   : > { %v5425_v36 = vsub.f32 %v2779_v22, %v5413_v20 }
 0x205   : > { %v2225_v21 = vpop.f32.mrf.mxu3 }
 0x206   : > { %v5405_v18 = vpop.f32.mrf.mxu0  ;;  %v5407_v44 = vpop.f32.mrf.mxu1  ;;  %v6085_v3 = vand.u32 4294901760, %v5425_v36 }
 0x207   : > { %v2158_v7 = vpop.f32.mrf.mxu2 }
 0x208   : > { %v5411_v41 = vadd.f32 %v2225_v21, %v2158_v7  ;;  %v1369_v21 = vadd.f32 %v5229_v10, %v1322_v52 }
 0x209   : > { %2572 = vmatmul.f32.gmra.mxu1 %v5361_v34  ;;  %2705 = vmatmul.f32.vlgmr.msra.gmra.mxu0 %v5304_v47 }
 0x20a   : > { %2884 = vmatmul.f32.vlgmr.msra.gmra.mxu3 %v5375_v4  ;;  %3137 = vmatpush.msra.mxu0 %v5015_v42  ;;  %v2785_v22 = vsel %vm2107_vm1, %v1369_v21, 0 }
 0x20b   : > { %2813 = vmatmul.f32.vlgmr.msra.gmra.mxu2 %v2812_v39  ;;  %3306 = vmatpush.msra.mxu3 %v5015_v42  ;;  %v1326_v39 = vadd.f32 %v5227_v29, %v5124_v11  ;;  %v2835_v29 = vsub.f32 %v5451_v6, %v6084_v48 }
 0x20c   : > { %3256 = vmatpush.msra.mxu2 %v5023_v13  ;;  %3139 = vmatpush.msra.mxu0 %v5063_v59 }
 0x20d   : > { %v2229_v62 = vpop.f32.mrf.mxu3  ;;  %3308 = vmatpush.msra.mxu3 %v5063_v59 }
 0x20e   : > { %v5432_v43 = vpop.f32.mrf.mxu0  ;;  %v5434_v19 = vpop.f32.mrf.mxu1  ;;  %3259 = vmatpush.msra.mxu2 %v5069_v14 }
 0x20f   : > { %v2166_v26 = vpop.f32.mrf.mxu2 }
 0x210   : > { %v5439_v17 = vadd.f32 %v2229_v62, %v2166_v26  ;;  %v5465_v62 = vand.u32 4294901760, %v2785_v22  ;;  %v1373_v26 = vadd.f32 %v5245_v55, %v1326_v39 }
 0x211   : > { %2709 = vmatmul.f32.gmra.mxu0 %v5316_v33  ;;  %2748 = vmatmul.f32.vlgmr.msra.gmra.mxu1 %v5304_v47  ;;  %v2827_v47 = vsub.f32 %v5425_v36, %v6085_v3 }
 0x212   : > { %2888 = vmatmul.f32.gmra.mxu3 %v5394_v63  ;;  %3208 = vmatpush.msra.mxu1 %v5041_v12  ;;  %v5473_v52 = vsub.f32 %v2785_v22, %v5465_v62  ;;  %v2836_v22 = vand.u32 4294901760, %v2835_v29 }
 0x213   : > { %2821 = vmatmul.f32.gmra.mxu2 %v2820_v31  ;;  %v2828_v61 = vand.u32 4294901760, %v2827_v47  ;;  %v2788_v31 = vsel %vm2107_vm1, %v1373_v26, 0 }
 0x214   : > { %3214 = vmatpush.msra.mxu1 %v5084_v5  ;;  %v5485_v55 = vand.u32 4294901760, %v2788_v31 }
 0x215   : > { %v2233_v49 = vpop.f32.mrf.mxu3 }
 0x216   : > { %v5457_v7 = vpop.f32.mrf.mxu0  ;;  %v5459_v10 = vpop.f32.mrf.mxu1  ;;  %v5492_v39 = vsub.f32 %v2788_v31, %v5485_v55 }
 0x217   : > { %v2174_v8 = vpop.f32.mrf.mxu2 }
 0x218   : > { %v5463_v56 = vadd.f32 %v2233_v49, %v2174_v8  ;;  %v6086_v8 = vand.u32 4294901760, %v5473_v52  ;;  %v6089_v29 = vand.u32 4294901760, %v5492_v39 }
 0x219   : > { %2713 = vmatmul.f32.gmra.mxu0 %v5328_v25  ;;  %2752 = vmatmul.f32.gmra.mxu1 %v5316_v33 }
 0x21a   : > { %2892 = vmatmul.f32.gmra.mxu3 %v5413_v20  ;;  %v2843_v26 = vsub.f32 %v5473_v52, %v6086_v8  ;;  %v2851_v8 = vsub.f32 %v5492_v39, %v6089_v29 }
 0x21b   : > { %2829 = vmatmul.f32.gmra.mxu2 %v2828_v61 }
 0x21d   : > { %v2237_v11 = vpop.f32.mrf.mxu3 }
 0x21e   : > { %v5479_v21 = vpop.f32.mrf.mxu0  ;;  %v5481_v33 = vpop.f32.mrf.mxu1 }
 0x21f   : > { %6122 = vst [vmem:[#allocation7_spill] sm:$0xff] %v5479_v21  ;;  %v2182_v49 = vpop.f32.mrf.mxu2 }
 0x220   : > { %v5483_v47 = vadd.f32 %v2237_v11, %v2182_v49 }
 0x221   : > { %2717 = vmatmul.f32.gmra.mxu0 %v5343_v27  ;;  %2756 = vmatmul.f32.gmra.mxu1 %v5328_v25  ;;  %v2844_v25 = vand.u32 4294901760, %v2843_v26 }
 0x222   : > { %2896 = vmatmul.f32.gmra.mxu3 %v5441_v37 }
 0x223   : > { %2837 = vmatmul.f32.gmra.mxu2 %v2836_v22 }
 0x225   : > { %v2241_v61 = vpop.f32.mrf.mxu3 }
 0x226   : > { %v5497_v11 = vpop.f32.mrf.mxu1  ;;  %v2267_v49 = vpop.f32.mrf.mxu0 }
 0x227   : > { %6123 = vst [vmem:[#allocation9_spill] sm:$0xff] %v5497_v11  ;;  %v2190_v48 = vpop.f32.mrf.mxu2  ;;  %v2268_v31 = vadd.f32 %v2267_v49, %v5391_v16 }
 0x228   : > { %v5499_v3 = vadd.f32 %v2241_v61, %v2190_v48 }
 0x229   : > { %2721 = vmatmul.f32.gmra.mxu0 %v5353_v53  ;;  %2760 = vmatmul.f32.gmra.mxu1 %v5343_v27  ;;  %v2852_v27 = vand.u32 4294901760, %v2851_v8 }
 0x22a   : > { %2900 = vmatmul.f32.gmra.mxu3 %v5465_v62 }
 0x22b   : > { %2845 = vmatmul.f32.gmra.mxu2 %v2844_v25 }
 0x22d   : > { %v2417_v22 = vpop.f32.mrf.mxu3 }
 0x22e   : > { %v2272_v23 = vpop.f32.mrf.mxu0  ;;  %v2317_v48 = vpop.f32.mrf.mxu1 }
 0x22f   : > { %v2318_v61 = vadd.f32 %v2317_v48, %v2268_v31  ;;  %v2374_v30 = vpop.f32.mrf.mxu2  ;;  %v2273_v16 = vadd.f32 %v2272_v23, %v5411_v41 }
 0x231   : > { %v2375_v11 = vadd.f32 %v2374_v30, %v2318_v61  ;;  %2725 = vmatmul.f32.gmra.mxu0 %v5361_v34  ;;  %2764 = vmatmul.f32.gmra.mxu1 %v5353_v53 }
 0x232   : > { %2904 = vmatmul.f32.gmra.mxu3 %v5485_v55 }
 0x233   : > { %v5512_v26 = vadd.f32 %v2417_v22, %v2375_v11  ;;  %2853 = vmatmul.f32.gmra.mxu2 %v2852_v27 }
 0x235   : > { %v2421_v49 = vpop.f32.mrf.mxu3 }
 0x236   : > { %v2277_v25 = vpop.f32.mrf.mxu0  ;;  %v2323_v29 = vpop.f32.mrf.mxu1 }
 0x237   : > { %v2324_v21 = vadd.f32 %v2323_v29, %v2273_v16  ;;  %v2378_v51 = vpop.f32.mrf.mxu2 }
 0x239   : > { %v2379_v31 = vadd.f32 %v2378_v51, %v2324_v21  ;;  %2768 = vmatmul.f32.gmra.mxu1 %v5361_v34  ;;  %2930 = vmatmul.f32.vlgmr.msrb.gmra.mxu0 %v5382_v45  ;;  %v2278_v51 = vadd.f32 %v2277_v25, %v5439_v17 }
 0x23a   : > { %3080 = vmatmul.f32.vlgmr.msrb.gmra.mxu3 %v5375_v4  ;;  %3363 = vmatpush.msrb.mxu0 %v5030_v15 }
 0x23b   : > { %v5519_v53 = vadd.f32 %v2421_v49, %v2379_v31  ;;  %3037 = vmatmul.f32.vlgmr.msrb.gmra.mxu2 %v5375_v4  ;;  %3540 = vmatpush.msrb.mxu3 %v5041_v12  ;;  %v6124_v12 = vand.u32 4294901760, %v5382_v45  ;;  %v6125_v45 = vand.u32 4294901760, %v5402_v0 }
 0x23c   : > { %3469 = vmatpush.msrb.mxu2 %v5015_v42  ;;  %3367 = vmatpush.msrb.mxu0 %v5075_v60 }
 0x23d   : > { %v2425_v30 = vpop.f32.mrf.mxu3  ;;  %3546 = vmatpush.msrb.mxu3 %v5084_v5 }
 0x23e   : > { %v2282_v34 = vpop.f32.mrf.mxu0  ;;  %v2329_v41 = vpop.f32.mrf.mxu1  ;;  %3471 = vmatpush.msrb.mxu2 %v5063_v59 }
 0x23f   : > { %v2330_v23 = vadd.f32 %v2329_v41, %v2278_v51  ;;  %v2382_v21 = vpop.f32.mrf.mxu2  ;;  %v2283_v5 = vadd.f32 %v2282_v34, %v5463_v56 }
 0x241   : > { %v2383_v8 = vadd.f32 %v2382_v21, %v2330_v23  ;;  %2935 = vmatmul.f32.gmra.mxu0 %v5402_v0  ;;  %2980 = vmatmul.f32.vlgmr.msrb.gmra.mxu1 %v6124_v12 }
 0x242   : > { %3084 = vmatmul.f32.gmra.mxu3 %v5394_v63  ;;  %3408 = vmatpush.msrb.mxu1 %v5015_v42 }
 0x243   : > { %v5533_v4 = vadd.f32 %v2425_v30, %v2383_v8  ;;  %3041 = vmatmul.f32.gmra.mxu2 %v5394_v63  ;;  %v6126_v30 = vand.u32 4294901760, %v5425_v36 }
 0x244   : > { %3410 = vmatpush.msrb.mxu1 %v5063_v59 }
 0x245   : > { %v2429_v17 = vpop.f32.mrf.mxu3 }
 0x246   : > { %v2287_v11 = vpop.f32.mrf.mxu0  ;;  %v2335_v29 = vpop.f32.mrf.mxu1 }
 0x247   : > { %v2336_v22 = vadd.f32 %v2335_v29, %v2283_v5  ;;  %v2386_v48 = vpop.f32.mrf.mxu2  ;;  %v2288_v63 = vadd.f32 %v2287_v11, %v5483_v47  ;;  %v6127_v5 = vand.u32 4294901760, %v5451_v6 }
 0x249   : > { %v2387_v61 = vadd.f32 %v2386_v48, %v2336_v22  ;;  %2940 = vmatmul.f32.gmra.mxu0 %v5425_v36  ;;  %2986 = vmatmul.f32.gmra.mxu1 %v6125_v45 }
 0x24a   : > { %3088 = vmatmul.f32.gmra.mxu3 %v5413_v20 }
 0x24b   : > { %v5542_v27 = vadd.f32 %v2429_v17, %v2387_v61  ;;  %3045 = vmatmul.f32.gmra.mxu2 %v5413_v20  ;;  %v3105_v20 = vsel %vm2107_vm1, %v5260_v54, 0 }
 0x24c   : > { %v5556_v21 = vand.u32 4294901760, %v3105_v20 }
 0x24d   : > { %v2433_v56 = vpop.f32.mrf.mxu3 }
 0x24e   : > { %v2292_v16 = vpop.f32.mrf.mxu0  ;;  %v2341_v49 = vpop.f32.mrf.mxu1 }
 0x24f   : > { %v2342_v25 = vadd.f32 %v2341_v49, %v2288_v63  ;;  %v2390_v31 = vpop.f32.mrf.mxu2  ;;  %v2293_v47 = vadd.f32 %v2292_v16, %v5499_v3  ;;  %v3108_v3 = vsel %vm2107_vm1, %v5267_v58, 0  ;;  %v6128_v63 = vand.u32 4294901760, %v5473_v52 }
 0x250   : > { %v5568_v48 = vand.u32 4294901760, %v3108_v3  ;;  %v3111_v16 = vsel %vm2107_vm1, %v5281_v38, 0  ;;  %v3114_v38 = vsel %vm2107_vm1, %v5290_v28, 0 }
 0x251   : > { %v2391_v51 = vadd.f32 %v2390_v31, %v2342_v25  ;;  %2945 = vmatmul.f32.gmra.mxu0 %v5451_v6  ;;  %2992 = vmatmul.f32.gmra.mxu1 %v6126_v30  ;;  %v5580_v30 = vand.u32 4294901760, %v3111_v16 }
 0x252   : > { %3092 = vmatmul.f32.gmra.mxu3 %v5441_v37 }
 0x253   : > { %v5550_v0 = vadd.f32 %v2433_v56, %v2391_v51  ;;  %3049 = vmatmul.f32.gmra.mxu2 %v5441_v37  ;;  %v3141_v37 = vsub.f32 %v3105_v20, %v5556_v21  ;;  %v3149_v56 = vsub.f32 %v3108_v3, %v5568_v48 }
 0x255   : > { %v2437_v34 = vpop.f32.mrf.mxu3  ;;  %v3142_v22 = vand.u32 4294901760, %v3141_v37 }
 0x256   : > { %v2347_v41 = vpop.f32.mrf.mxu1  ;;  %v2482_v23 = vpop.f32.mrf.mxu0 }
 0x257   : > { %v2348_v8 = vadd.f32 %v2347_v41, %v2293_v47  ;;  %v2394_v12 = vpop.f32.mrf.mxu2  ;;  %v3150_v47 = vand.u32 4294901760, %v3149_v56  ;;  %v6129_v41 = vand.u32 4294901760, %v5492_v39 }
 0x259   : > { %v2395_v36 = vadd.f32 %v2394_v12, %v2348_v8  ;;  %2950 = vmatmul.f32.gmra.mxu0 %v5473_v52  ;;  %2998 = vmatmul.f32.gmra.mxu1 %v6127_v5  ;;  %v5594_v12 = vand.u32 4294901760, %v3114_v38 }
 0x25a   : > { %3096 = vmatmul.f32.gmra.mxu3 %v5465_v62 }
 0x25b   : > { %v5563_v54 = vadd.f32 %v2437_v34, %v2395_v36  ;;  %3053 = vmatmul.f32.gmra.mxu2 %v5465_v62  ;;  %v3143_v62 = vsub.f32 %v3141_v37, %v3142_v22 }
 0x25d   : > { %v2649_v17 = vpop.f32.mrf.mxu3  ;;  %v3144_v51 = vand.u32 4294901760, %v3143_v62 }
 0x25e   : > { %v2490_v11 = vpop.f32.mrf.mxu0  ;;  %v2553_v29 = vpop.f32.mrf.mxu1 }
 0x25f   : > { %v2554_v61 = vadd.f32 %v2553_v29, %v2482_v23  ;;  %v2599_v6 = vpop.f32.mrf.mxu2  ;;  %v3151_v23 = vsub.f32 %v3149_v56, %v3150_v47 }
 0x261   : > { %v2600_v45 = vadd.f32 %v2599_v6, %v2554_v61  ;;  %2955 = vmatmul.f32.gmra.mxu0 %v5492_v39  ;;  %3004 = vmatmul.f32.gmra.mxu1 %v6128_v63 }
 0x262   : > { %3100 = vmatmul.f32.gmra.mxu3 %v5485_v55 }
 0x263   : > { %3057 = vmatmul.f32.gmra.mxu2 %v5485_v55  ;;  %v5576_v58 = vadd.f32 %v2649_v17, %v2600_v45  ;;  %v3157_v55 = vsub.f32 %v3111_v16, %v5580_v30 }
 0x265   : > { %v2655_v49 = vpop.f32.mrf.mxu3  ;;  %v3158_v3 = vand.u32 4294901760, %v3157_v55 }
 0x266   : > { %v2498_v25 = vpop.f32.mrf.mxu0  ;;  %v2557_v31 = vpop.f32.mrf.mxu1 }
 0x267   : > { %v2558_v52 = vadd.f32 %v2557_v31, %v2490_v11  ;;  %v2604_v20 = vpop.f32.mrf.mxu2 }
 0x269   : > { %v2605_v34 = vadd.f32 %v2604_v20, %v2558_v52  ;;  %3010 = vmatmul.f32.gmra.mxu1 %v6129_v41  ;;  %3145 = vmatmul.f32.vlgmr.msra.gmra.mxu0 %v3144_v51 }
 0x26a   : > { %3312 = vmatmul.f32.vlgmr.msra.gmra.mxu3 %v3142_v22  ;;  %3588 = vmatpush.msra.mxu0 %v5023_v13 }
 0x26b   : > { %3262 = vmatmul.f32.vlgmr.msra.gmra.mxu2 %v3141_v37  ;;  %v5588_v8 = vadd.f32 %v2655_v49, %v2605_v34  ;;  %3740 = vmatpush.msra.mxu3 %v5015_v42  ;;  %v3152_v37 = vand.u32 4294901760, %v3151_v23 }
 0x26c   : > { %3695 = vmatpush.msra.mxu2 %v5030_v15  ;;  %3591 = vmatpush.msra.mxu0 %v5069_v14  ;;  %v3165_v15 = vsub.f32 %v3114_v38, %v5594_v12  ;;  %v3159_v14 = vsub.f32 %v3157_v55, %v3158_v3 }
 0x26d   : > { %v2661_v39 = vpop.f32.mrf.mxu3  ;;  %3742 = vmatpush.msra.mxu3 %v5063_v59 }
 0x26e   : > { %v2506_v13 = vpop.f32.mrf.mxu0  ;;  %v2561_v36 = vpop.f32.mrf.mxu1  ;;  %3699 = vmatpush.msra.mxu2 %v5075_v60  ;;  %v3117_v60 = vsel %vm2107_vm1, %v5298_v1, 0  ;;  %v3166_v6 = vand.u32 4294901760, %v3165_v15  ;;  %v3160_v16 = vand.u32 4294901760, %v3159_v14 }
 0x26f   : > { %v2562_v28 = vadd.f32 %v2561_v36, %v2498_v25  ;;  %v2609_v5 = vpop.f32.mrf.mxu2  ;;  %v5605_v45 = vand.u32 4294901760, %v3117_v60 }
 0x271   : > { %v2610_v17 = vadd.f32 %v2609_v5, %v2562_v28  ;;  %3153 = vmatmul.f32.gmra.mxu0 %v3152_v37  ;;  %3216 = vmatmul.f32.vlgmr.msra.gmra.mxu1 %v5556_v21  ;;  %v2042_v5 = vadd.f32 %v5385_v46, %v5334_v35 }
 0x272   : > { %3318 = vmatmul.f32.gmra.mxu3 %v3150_v47  ;;  %3638 = vmatpush.msra.mxu1 %v5015_v42  ;;  %v3167_v42 = vsub.f32 %v3165_v15, %v3166_v6  ;;  %v2038_v47 = vadd.f32 %v5371_v40, %v5324_v9 }
 0x273   : > { %3267 = vmatmul.f32.gmra.mxu2 %v3149_v56  ;;  %v5600_v11 = vadd.f32 %v2661_v39, %v2610_v17  ;;  %v3173_v56 = vsub.f32 %v3117_v60, %v5605_v45  ;;  %v2089_v60 = vadd.f32 %v5407_v44, %v2042_v5 }
 0x274   : > { %3640 = vmatpush.msra.mxu1 %v5063_v59  ;;  %v3120_v59 = vsel %vm2107_vm1, %v5311_v2, 0  ;;  %v3168_v52 = vand.u32 4294901760, %v3167_v42  ;;  %v2085_v23 = vadd.f32 %v5387_v24, %v2038_v47 }
 0x275   : > { %v2667_v29 = vpop.f32.mrf.mxu3  ;;  %v5613_v20 = vand.u32 4294901760, %v3120_v59  ;;  %v3174_v38 = vand.u32 4294901760, %v3173_v56  ;;  %v3440_v35 = vsel %vm2107_vm1, %v2089_v60, 0 }
 0x276   : > { %v2514_v22 = vpop.f32.mrf.mxu0  ;;  %v2565_v61 = vpop.f32.mrf.mxu1  ;;  %v3437_v36 = vsel %vm2107_vm1, %v2085_v23, 0 }
 0x277   : > { %v2566_v63 = vadd.f32 %v2565_v61, %v2506_v13  ;;  %v2614_v62 = vpop.f32.mrf.mxu2  ;;  %v3181_v2 = vsub.f32 %v3120_v59, %v5613_v20  ;;  %v3175_v39 = vsub.f32 %v3173_v56, %v3174_v38  ;;  %v5625_v14 = vand.u32 4294901760, %v3437_v36 }
 0x278   : > { %v5639_v59 = vand.u32 4294901760, %v3440_v35 }
 0x279   : > { %v2615_v49 = vadd.f32 %v2614_v62, %v2566_v63  ;;  %3161 = vmatmul.f32.gmra.mxu0 %v3160_v16  ;;  %3220 = vmatmul.f32.gmra.mxu1 %v5568_v48  ;;  %v3182_v17 = vand.u32 4294901760, %v3181_v2  ;;  %v5632_v61 = vsub.f32 %v3437_v36, %v5625_v14 }
 0x27a   : > { %3324 = vmatmul.f32.gmra.mxu3 %v3158_v3  ;;  %v3176_v3 = vand.u32 4294901760, %v3175_v39  ;;  %v5662_v47 = vsub.f32 %v3440_v35, %v5639_v59 }
 0x27b   : > { %3272 = vmatmul.f32.gmra.mxu2 %v3157_v55  ;;  %v5609_v1 = vadd.f32 %v2667_v29, %v2615_v49  ;;  %v3183_v29 = vsub.f32 %v3181_v2, %v3182_v17  ;;  %v3474_v42 = vand.u32 4294901760, %v5632_v61 }
 0x27d   : > { %v2673_v25 = vpop.f32.mrf.mxu3  ;;  %v3184_v49 = vand.u32 4294901760, %v3183_v29 }
 0x27e   : > { %v2522_v31 = vpop.f32.mrf.mxu0  ;;  %v2569_v51 = vpop.f32.mrf.mxu1 }
 0x27f   : > { %v2570_v34 = vadd.f32 %v2569_v51, %v2514_v22  ;;  %v2619_v41 = vpop.f32.mrf.mxu2 }
 0x281   : > { %v2620_v55 = vadd.f32 %v2619_v41, %v2570_v34  ;;  %3169 = vmatmul.f32.gmra.mxu0 %v3168_v52  ;;  %3224 = vmatmul.f32.gmra.mxu1 %v5580_v30  ;;  %v2050_v41 = vadd.f32 %v5432_v43, %v5357_v57 }
 0x282   : > { %3330 = vmatmul.f32.gmra.mxu3 %v3166_v6 }
 0x283   : > { %3277 = vmatmul.f32.gmra.mxu2 %v3165_v15  ;;  %v5620_v13 = vadd.f32 %v2673_v25, %v2620_v55  ;;  %v2097_v36 = vadd.f32 %v5459_v10, %v2050_v41  ;;  %v6130_v41 = vld [vmem:[#allocation5_spill] sm:$0xff] }
 0x285   : > { %v2679_v28 = vpop.f32.mrf.mxu3 }
 0x286   : > { %v2573_v9 = vpop.f32.mrf.mxu1  ;;  %v2706_v40 = vpop.f32.mrf.mxu0 }
 0x287   : > { %v2574_v24 = vadd.f32 %v2573_v9, %v2522_v31  ;;  %v2624_v37 = vpop.f32.mrf.mxu2  ;;  %v2707_v46 = vadd.f32 %v2706_v40, %v5576_v58  ;;  %v5645_v31 = vmul.f32 %v5512_v26, %v5512_v26  ;;  %v3482_v9 = vand.u32 4294901760, %v5662_v47 }
 0x289   : > { %v2625_v15 = vadd.f32 %v2624_v37, %v2574_v24  ;;  %3177 = vmatmul.f32.gmra.mxu0 %v3176_v3  ;;  %3228 = vmatmul.f32.gmra.mxu1 %v5594_v12  ;;  %v3483_v5 = vsub.f32 %v5662_v47, %v3482_v9 }
 0x28a   : > { %3336 = vmatmul.f32.gmra.mxu3 %v3174_v38 }
 0x28b   : > { %3282 = vmatmul.f32.gmra.mxu2 %v3173_v56  ;;  %v5629_v22 = vadd.f32 %v2679_v28, %v2625_v15  ;;  %v2046_v56 = vadd.f32 %v5405_v18, %v5348_v32  ;;  %v3475_v18 = vsub.f32 %v5632_v61, %v3474_v42 }
 0x28d   : > { %v2885_v6 = vpop.f32.mrf.mxu3  ;;  %v2093_v52 = vadd.f32 %v5434_v19, %v2046_v56 }
 0x28e   : > { %v2710_v63 = vpop.f32.mrf.mxu0  ;;  %v2749_v62 = vpop.f32.mrf.mxu1 }
 0x28f   : > { %v2750_v44 = vadd.f32 %v2749_v62, %v2707_v46  ;;  %v2814_v16 = vpop.f32.mrf.mxu2  ;;  %v3443_v19 = vsel %vm2107_vm1, %v2093_v52, 0  ;;  %v3484_v62 = vand.u32 4294901760, %v3483_v5 }
 0x290   : > { %v5641_v25 = vadd.f32 %v2885_v6, %v2814_v16  ;;  %v5672_v40 = vand.u32 4294901760, %v3443_v19 }
 0x291   : > { %v5647_v58 = vmul.f32 %v2750_v44, %v2750_v44  ;;  %v5650_v51 = vmul.f32 %v2750_v44, %v5512_v26  ;;  %3185 = vmatmul.f32.gmra.mxu0 %v3184_v49  ;;  %3232 = vmatmul.f32.gmra.mxu1 %v5605_v45  ;;  %v2711_v26 = vadd.f32 %v2710_v63, %v5588_v8 }
 0x292   : > { %3342 = vmatmul.f32.gmra.mxu3 %v3182_v17  ;;  %v5676_v8 = vmul.f32 %v5519_v53, %v5519_v53  ;;  %v5694_v24 = vsub.f32 %v3443_v19, %v5672_v40  ;;  %v2054_v17 = vadd.f32 %v5457_v7, %v5368_v50  ;;  %v5707_v44 = vmul.f32 %v5533_v4, %v5533_v4  ;;  %v6131_v19 = vld [vmem:[#allocation7_spill] sm:$0xff] }
 0x293   : > { %v5656_v32 = vadd.f32 %v5647_v58, %v5645_v31  ;;  %3287 = vmatmul.f32.gmra.mxu2 %v3181_v2  ;;  %v3476_v2 = vand.u32 4294901760, %v3475_v18 }
 0x294   : > { %v2101_v6 = vadd.f32 %v5481_v33, %v2054_v17  ;;  %v3490_v50 = vand.u32 4294901760, %v5694_v24 }
 0x295   : > { %v2889_v34 = vpop.f32.mrf.mxu3 }
 0x296   : > { %v2714_v38 = vpop.f32.mrf.mxu0  ;;  %v2753_v23 = vpop.f32.mrf.mxu1  ;;  %v3449_v49 = vsel %vm2107_vm1, %v2101_v6, 0 }
 0x297   : > { %v2754_v55 = vadd.f32 %v2753_v23, %v2711_v26  ;;  %v2822_v39 = vpop.f32.mrf.mxu2  ;;  %v2715_v37 = vadd.f32 %v2714_v38, %v5600_v11  ;;  %v2058_v38 = vadd.f32 %v6131_v19, %v6130_v41  ;;  %v5732_v23 = vand.u32 4294901760, %v3449_v49 }
 0x298   : > { %v5669_v28 = vadd.f32 %v2889_v34, %v2822_v39 }
 0x299   : > { %v5678_v57 = vmul.f32 %v2754_v55, %v2754_v55  ;;  %v5681_v43 = vmul.f32 %v2754_v55, %v5519_v53  ;;  %3236 = vmatmul.f32.gmra.mxu1 %v5613_v20  ;;  %3369 = vmatmul.f32.vlgmr.msrb.gmra.mxu0 %v5556_v21  ;;  %v3446_v53 = vsel %vm2107_vm1, %v2097_v36, 0  ;;  %v5755_v17 = vsub.f32 %v3449_v49, %v5732_v23 }
 0x29a   : > { %3548 = vmatmul.f32.vlgmr.msrb.gmra.mxu3 %v5625_v14  ;;  %v5700_v46 = vand.u32 4294901760, %v3446_v53 }
 0x29b   : > { %v5688_v10 = vadd.f32 %v5678_v57, %v5676_v8  ;;  %3477 = vmatmul.f32.vlgmr.msrb.gmra.mxu2 %v3476_v2 }
 0x29c   : > { %v5723_v33 = vsub.f32 %v3446_v53, %v5700_v46  ;;  %v6132_v53 = vld [vmem:[#allocation9_spill] sm:$0xff] }
 0x29d   : > { %v2893_v3 = vpop.f32.mrf.mxu3 }
 0x29e   : > { %v2718_v60 = vpop.f32.mrf.mxu0  ;;  %v2757_v15 = vpop.f32.mrf.mxu1  ;;  %v3498_v39 = vand.u32 4294901760, %v5723_v33 }
 0x29f   : > { %v2758_v29 = vadd.f32 %v2757_v15, %v2715_v37  ;;  %v2830_v35 = vpop.f32.mrf.mxu2  ;;  %v2105_v37 = vadd.f32 %v6132_v53, %v2058_v38 }
 0x2a0   : > { %v5703_v63 = vadd.f32 %v2893_v3, %v2830_v35 }
 0x2a1   : > { %v5709_v11 = vmul.f32 %v2758_v29, %v2758_v29  ;;  %v5712_v16 = vmul.f32 %v2758_v29, %v5533_v4  ;;  %3373 = vmatmul.f32.gmra.mxu0 %v5568_v48  ;;  %3412 = vmatmul.f32.vlgmr.msrb.gmra.mxu1 %v5556_v21  ;;  %v2719_v4 = vadd.f32 %v2718_v60, %v5609_v1  ;;  %v3452_v15 = vsel %vm2107_vm1, %v2105_v37, 0 }
 0x2a2   : > { %3552 = vmatmul.f32.gmra.mxu3 %v5639_v59  ;;  %v3491_v21 = vsub.f32 %v5694_v24, %v3490_v50  ;;  %v5739_v1 = vmul.f32 %v5542_v27, %v5542_v27  ;;  %v5765_v49 = vand.u32 4294901760, %v3452_v15 }
 0x2a3   : > { %v5720_v7 = vadd.f32 %v5709_v11, %v5707_v44  ;;  %3485 = vmatmul.f32.gmra.mxu2 %v3484_v62 }
 0x2a4   : > { %v3492_v5 = vand.u32 4294901760, %v3491_v21  ;;  %v3506_v21 = vand.u32 4294901760, %v5755_v17  ;;  %v5787_v41 = vsub.f32 %v3452_v15, %v5765_v49 }
 0x2a5   : > { %v2897_v56 = vpop.f32.mrf.mxu3 }
 0x2a6   : > { %v2722_v52 = vpop.f32.mrf.mxu0  ;;  %v2761_v18 = vpop.f32.mrf.mxu1 }
 0x2a7   : > { %v2762_v26 = vadd.f32 %v2761_v18, %v2719_v4  ;;  %v2838_v34 = vpop.f32.mrf.mxu2  ;;  %v2723_v60 = vadd.f32 %v2722_v52, %v5620_v13  ;;  %v5769_v18 = vmul.f32 %v5550_v0, %v5550_v0 }
 0x2a8   : > { %v5734_v55 = vadd.f32 %v2897_v56, %v2838_v34  ;;  %v3507_v34 = vsub.f32 %v5755_v17, %v3506_v21 }
 0x2a9   : > { %v5741_v2 = vmul.f32 %v2762_v26, %v2762_v26  ;;  %v5744_v36 = vmul.f32 %v2762_v26, %v5542_v27  ;;  %3377 = vmatmul.f32.gmra.mxu0 %v5580_v30  ;;  %3416 = vmatmul.f32.gmra.mxu1 %v5568_v48  ;;  %v3499_v27 = vsub.f32 %v5723_v33, %v3498_v39 }
 0x2aa   : > { %3556 = vmatmul.f32.gmra.mxu3 %v5672_v40 }
 0x2ab   : > { %v5752_v3 = vadd.f32 %v5741_v2, %v5739_v1  ;;  %3493 = vmatmul.f32.gmra.mxu2 %v3492_v5  ;;  %v3500_v56 = vand.u32 4294901760, %v3499_v27 }
 0x2ad   : > { %v2901_v48 = vpop.f32.mrf.mxu3 }
 0x2ae   : > { %v2726_v29 = vpop.f32.mrf.mxu0  ;;  %v2765_v35 = vpop.f32.mrf.mxu1 }
 0x2af   : > { %v2766_v6 = vadd.f32 %v2765_v35, %v2723_v60  ;;  %v2846_v62 = vpop.f32.mrf.mxu2  ;;  %v3508_v60 = vand.u32 4294901760, %v3507_v34 }
 0x2b0   : > { %v5762_v4 = vadd.f32 %v2901_v48, %v2846_v62  ;;  %v5795_v48 = vmul.f32 %v5563_v54, %v5563_v54 }
 0x2b1   : > { %v5771_v26 = vmul.f32 %v2766_v6, %v2766_v6  ;;  %v5774_v13 = vmul.f32 %v2766_v6, %v5550_v0  ;;  %3381 = vmatmul.f32.gmra.mxu0 %v5594_v12  ;;  %3420 = vmatmul.f32.gmra.mxu1 %v5580_v30  ;;  %v2727_v0 = vadd.f32 %v2726_v29, %v5629_v22  ;;  %v3514_v22 = vand.u32 4294901760, %v5787_v41 }
 0x2b2   : > { %3560 = vmatmul.f32.gmra.mxu3 %v5700_v46 }
 0x2b3   : > { %v5781_v52 = vadd.f32 %v5771_v26, %v5769_v18  ;;  %3501 = vmatmul.f32.gmra.mxu2 %v3500_v56  ;;  %v3515_v6 = vsub.f32 %v5787_v41, %v3514_v22 }
 0x2b5   : > { %v2905_v19 = vpop.f32.mrf.mxu3 }
 0x2b6   : > { %v2769_v38 = vpop.f32.mrf.mxu1  ;;  %v2931_v5 = vpop.f32.mrf.mxu0 }
 0x2b7   : > { %v2770_v30 = vadd.f32 %v2769_v38, %v2727_v0  ;;  %v2854_v53 = vpop.f32.mrf.mxu2  ;;  %v2932_v37 = vadd.f32 %v2931_v5, %v5641_v25 }
 0x2b8   : > { %v5791_v27 = vadd.f32 %v2905_v19, %v2854_v53  ;;  %v3516_v19 = vand.u32 4294901760, %v3515_v6 }
 0x2b9   : > { %v5797_v35 = vmul.f32 %v2770_v30, %v2770_v30  ;;  %v5800_v15 = vmul.f32 %v2770_v30, %v5563_v54  ;;  %3385 = vmatmul.f32.gmra.mxu0 %v5605_v45  ;;  %3424 = vmatmul.f32.gmra.mxu1 %v5594_v12 }
 0x2ba   : > { %3564 = vmatmul.f32.gmra.mxu3 %v5732_v23 }
 0x2bb   : > { %v5808_v25 = vadd.f32 %v5797_v35, %v5795_v48  ;;  %3509 = vmatmul.f32.gmra.mxu2 %v3508_v60 }
 0x2bd   : > { %v3081_v29 = vpop.f32.mrf.mxu3 }
 0x2be   : > { %v2936_v54 = vpop.f32.mrf.mxu0  ;;  %v2981_v62 = vpop.f32.mrf.mxu1 }
 0x2bf   : > { %v2937_v56 = vadd.f32 %v2936_v54, %v5669_v28  ;;  %v2982_v34 = vadd.f32 %v2981_v62, %v2932_v37  ;;  %v3038_v12 = vpop.f32.mrf.mxu2 }
 0x2c1   : > { %v3039_v0 = vadd.f32 %v3038_v12, %v2982_v34  ;;  %3389 = vmatmul.f32.gmra.mxu0 %v5613_v20  ;;  %3428 = vmatmul.f32.gmra.mxu1 %v5605_v45 }
 0x2c2   : > { %3568 = vmatmul.f32.gmra.mxu3 %v5765_v49 }
 0x2c3   : > { %v5817_v38 = vadd.f32 %v3081_v29, %v3039_v0  ;;  %3517 = vmatmul.f32.gmra.mxu2 %v3516_v19 }
 0x2c5   : > { %v3786_v5 = vsub.f32 %v5817_v38, %v5645_v31  ;;  %v3085_v30 = vpop.f32.mrf.mxu3 }
 0x2c6   : > { %v2941_v53 = vpop.f32.mrf.mxu0  ;;  %v2987_v60 = vpop.f32.mrf.mxu1 }
 0x2c7   : > { %v2942_v28 = vadd.f32 %v2941_v53, %v5703_v63  ;;  %v2988_v37 = vadd.f32 %v2987_v60, %v2937_v56  ;;  %v3042_v54 = vpop.f32.mrf.mxu2 }
 0x2c9   : > { %v3043_v62 = vadd.f32 %v3042_v54, %v2988_v37  ;;  %3432 = vmatmul.f32.gmra.mxu1 %v5613_v20  ;;  %3594 = vmatmul.f32.vlgmr.msra.gmra.mxu0 %v5632_v61 }
 0x2ca   : > { %3744 = vmatmul.f32.vlgmr.msra.gmra.mxu3 %v5625_v14 }
 0x2cb   : > { %v5825_v45 = vadd.f32 %v3085_v30, %v3043_v62  ;;  %3701 = vmatmul.f32.vlgmr.msra.gmra.mxu2 %v5625_v14 }
 0x2cd   : > { %v3787_v29 = vsub.f32 %v5825_v45, %v5676_v8  ;;  %v3089_v6 = vpop.f32.mrf.mxu3 }
 0x2ce   : > { %v2946_v34 = vpop.f32.mrf.mxu0  ;;  %v2993_v12 = vpop.f32.mrf.mxu1 }
 0x2cf   : > { %v2947_v63 = vadd.f32 %v2946_v34, %v5734_v55  ;;  %v2994_v56 = vadd.f32 %v2993_v12, %v2942_v28  ;;  %v3046_v0 = vpop.f32.mrf.mxu2 }
 0x2d1   : > { %v3047_v19 = vadd.f32 %v3046_v0, %v2994_v56  ;;  %3599 = vmatmul.f32.gmra.mxu0 %v5662_v47  ;;  %3644 = vmatmul.f32.vlgmr.msra.gmra.mxu1 %v3474_v42 }
 0x2d2   : > { %3748 = vmatmul.f32.gmra.mxu3 %v5639_v59 }
 0x2d3   : > { %v5835_v20 = vadd.f32 %v3089_v6, %v3047_v19  ;;  %3705 = vmatmul.f32.gmra.mxu2 %v5639_v59 }
 0x2d5   : > { %v3788_v14 = vsub.f32 %v5835_v20, %v5707_v44  ;;  %v3093_v30 = vpop.f32.mrf.mxu3 }
 0x2d6   : > { %v2951_v53 = vpop.f32.mrf.mxu0  ;;  %v2999_v55 = vpop.f32.mrf.mxu1 }
 0x2d7   : > { %v2952_v60 = vadd.f32 %v2951_v53, %v5762_v4  ;;  %v3000_v28 = vadd.f32 %v2999_v55, %v2947_v63  ;;  %v3050_v37 = vpop.f32.mrf.mxu2 }
 0x2d9   : > { %v3051_v54 = vadd.f32 %v3050_v37, %v3000_v28  ;;  %3604 = vmatmul.f32.gmra.mxu0 %v5694_v24  ;;  %3650 = vmatmul.f32.gmra.mxu1 %v3482_v9 }
 0x2da   : > { %3752 = vmatmul.f32.gmra.mxu3 %v5672_v40 }
 0x2db   : > { %v5845_v61 = vadd.f32 %v3093_v30, %v3051_v54  ;;  %3709 = vmatmul.f32.gmra.mxu2 %v5672_v40 }
 0x2dd   : > { %v3789_v42 = vsub.f32 %v5845_v61, %v5739_v1  ;;  %v3097_v59 = vpop.f32.mrf.mxu3 }
 0x2de   : > { %v2956_v62 = vpop.f32.mrf.mxu0  ;;  %v3005_v4 = vpop.f32.mrf.mxu1 }
 0x2df   : > { %v2957_v6 = vadd.f32 %v2956_v62, %v5791_v27  ;;  %v3006_v34 = vadd.f32 %v3005_v4, %v2952_v60  ;;  %v3054_v12 = vpop.f32.mrf.mxu2 }
 0x2e1   : > { %v3055_v63 = vadd.f32 %v3054_v12, %v3006_v34  ;;  %3609 = vmatmul.f32.gmra.mxu0 %v5723_v33  ;;  %3656 = vmatmul.f32.gmra.mxu1 %v3490_v50 }
 0x2e2   : > { %3756 = vmatmul.f32.gmra.mxu3 %v5700_v46 }
 0x2e3   : > { %v5855_v47 = vadd.f32 %v3097_v59, %v3055_v63  ;;  %3713 = vmatmul.f32.gmra.mxu2 %v5700_v46 }
 0x2e5   : > { %v3790_v9 = vsub.f32 %v5855_v47, %v5769_v18  ;;  %v3101_v40 = vpop.f32.mrf.mxu3  ;;  %v3845_v47 = vadd.f32 6.5025, %v5808_v25 }
 0x2e6   : > { %v3011_v56 = vpop.f32.mrf.mxu1  ;;  %v3146_v27 = vpop.f32.mrf.mxu0 }
 0x2e7   : > { %v3012_v0 = vadd.f32 %v3011_v56, %v2957_v6  ;;  %v3058_v19 = vpop.f32.mrf.mxu2 }
 0x2e9   : > { %v3059_v30 = vadd.f32 %v3058_v19, %v3012_v0  ;;  %3614 = vmatmul.f32.gmra.mxu0 %v5755_v17  ;;  %3662 = vmatmul.f32.gmra.mxu1 %v3498_v39 }
 0x2ea   : > { %3760 = vmatmul.f32.gmra.mxu3 %v5732_v23 }
 0x2eb   : > { %v5864_v24 = vadd.f32 %v3101_v40, %v3059_v30  ;;  %3717 = vmatmul.f32.gmra.mxu2 %v5732_v23 }
 0x2ed   : > { %v3791_v46 = vsub.f32 %v5864_v24, %v5795_v48  ;;  %v3313_v50 = vpop.f32.mrf.mxu3 }
 0x2ee   : > { %v3154_v53 = vpop.f32.mrf.mxu0  ;;  %v3217_v55 = vpop.f32.mrf.mxu1 }
 0x2ef   : > { %v3218_v60 = vadd.f32 %v3217_v55, %v3146_v27  ;;  %v3263_v28 = vpop.f32.mrf.mxu2 }
 0x2f1   : > { %v3264_v37 = vadd.f32 %v3263_v28, %v3218_v60  ;;  %3619 = vmatmul.f32.gmra.mxu0 %v5787_v41  ;;  %3668 = vmatmul.f32.gmra.mxu1 %v3506_v21 }
 0x2f2   : > { %3764 = vmatmul.f32.gmra.mxu3 %v5765_v49 }
 0x2f3   : > { %3721 = vmatmul.f32.gmra.mxu2 %v5765_v49  ;;  %v3314_v33 = vadd.f32 %v3313_v50, %v3264_v37 }
 0x2f5   : > { %v3319_v23 = vpop.f32.mrf.mxu3 }
 0x2f6   : > { %v3162_v39 = vpop.f32.mrf.mxu0  ;;  %v3221_v54 = vpop.f32.mrf.mxu1 }
 0x2f7   : > { %v3222_v59 = vadd.f32 %v3221_v54, %v3154_v53  ;;  %v3268_v62 = vpop.f32.mrf.mxu2 }
 0x2f9   : > { %v3269_v4 = vadd.f32 %v3268_v62, %v3222_v59  ;;  %3674 = vmatmul.f32.gmra.mxu1 %v3514_v22 }
 0x2fb   : > { %v3320_v6 = vadd.f32 %v3319_v23, %v3269_v4 }
 0x2fd   : > { %v3325_v34 = vpop.f32.mrf.mxu3 }
 0x2fe   : > { %v3170_v12 = vpop.f32.mrf.mxu0  ;;  %v3225_v63 = vpop.f32.mrf.mxu1 }
 0x2ff   : > { %v3226_v17 = vadd.f32 %v3225_v63, %v3162_v39  ;;  %v3273_v21 = vpop.f32.mrf.mxu2 }
 0x301   : > { %v3274_v40 = vadd.f32 %v3273_v21, %v3226_v17 }
 0x303   : > { %v3326_v56 = vadd.f32 %v3325_v34, %v3274_v40 }
 0x305   : > { %v3331_v27 = vpop.f32.mrf.mxu3 }
 0x306   : > { %v3178_v49 = vpop.f32.mrf.mxu0  ;;  %v3229_v0 = vpop.f32.mrf.mxu1 }
 0x307   : > { %v3230_v19 = vadd.f32 %v3229_v0, %v3170_v12  ;;  %v3278_v30 = vpop.f32.mrf.mxu2 }
 0x309   : > { %v3279_v50 = vadd.f32 %v3278_v30, %v3230_v19 }
 0x30b   : > { %v3332_v53 = vadd.f32 %v3331_v27, %v3279_v50  ;;  %v3840_v50 = vadd.f32 6.5025, %v5656_v32 }
 0x30d   : > { %v3337_v55 = vpop.f32.mrf.mxu3 }
 0x30e   : > { %v3186_v60 = vpop.f32.mrf.mxu0  ;;  %v3233_v28 = vpop.f32.mrf.mxu1 }
 0x30f   : > { %v3234_v41 = vadd.f32 %v3233_v28, %v3178_v49  ;;  %v3283_v22 = vpop.f32.mrf.mxu2 }
 0x311   : > { %v3284_v37 = vadd.f32 %v3283_v22, %v3234_v41 }
 0x313   : > { %v3338_v23 = vadd.f32 %v3337_v55, %v3284_v37 }
 0x315   : > { %v3343_v54 = vpop.f32.mrf.mxu3 }
 0x316   : > { %v3237_v59 = vpop.f32.mrf.mxu1  ;;  %v3370_v39 = vpop.f32.mrf.mxu0 }
 0x317   : > { %v3238_v62 = vadd.f32 %v3237_v59, %v3186_v60  ;;  %v3288_v4 = vpop.f32.mrf.mxu2  ;;  %v3371_v34 = vadd.f32 %v3370_v39, %v3314_v33 }
 0x319   : > { %v3289_v63 = vadd.f32 %v3288_v4, %v3238_v62 }
 0x31b   : > { %v3344_v17 = vadd.f32 %v3343_v54, %v3289_v63 }
 0x31d   : > { %v3549_v21 = vpop.f32.mrf.mxu3 }
 0x31e   : > { %v3374_v12 = vpop.f32.mrf.mxu0  ;;  %v3413_v40 = vpop.f32.mrf.mxu1 }
 0x31f   : > { %v3414_v0 = vadd.f32 %v3413_v40, %v3371_v34  ;;  %v3478_v27 = vpop.f32.mrf.mxu2  ;;  %v3375_v55 = vadd.f32 %v3374_v12, %v3320_v6 }
 0x320   : > { %v5876_v19 = vadd.f32 %v3549_v21, %v3478_v27 }
 0x321   : > { %v3792_v49 = vsub.f32 %v3414_v0, %v5647_v58  ;;  %v3841_v58 = vadd.f32 6.5025, %v5688_v10 }
 0x323   : > { %v3846_v30 = vadd.f32 %v3792_v49, %v3786_v5 }
 0x325   : > { %v3852_v60 = vadd.f32 58.5225, %v3846_v30  ;;  %v3553_v33 = vpop.f32.mrf.mxu3 }
 0x326   : > { %v3378_v28 = vpop.f32.mrf.mxu0  ;;  %v3417_v41 = vpop.f32.mrf.mxu1 }
 0x327   : > { %v5883_v22 = vmul.f32 %v3852_v60, %v3840_v50  ;;  %v3418_v37 = vadd.f32 %v3417_v41, %v3375_v55  ;;  %v3486_v54 = vpop.f32.mrf.mxu2  ;;  %v3379_v32 = vadd.f32 %v3378_v28, %v3326_v56 }
 0x328   : > { %v5885_v59 = vadd.f32 %v3553_v33, %v3486_v54 }
 0x329   : > { %v3793_v39 = vsub.f32 %v3418_v37, %v5678_v57  ;;  %v3842_v57 = vadd.f32 6.5025, %v5720_v7  ;;  %4115 = vrcp.f32 %v5883_v22  ;;  %vm3869_vm3 = vweird.f32 %v5883_v22 }
 0x32b   : > { %v3847_v31 = vadd.f32 %v3793_v39, %v3787_v29 }
 0x32d   : > { %v3853_v38 = vadd.f32 58.5225, %v3847_v31  ;;  %v5892_v5 = vpop.f32.mrf.mxu3 }
 0x32e   : > { %v3382_v6 = vpop.f32.mrf.mxu0  ;;  %v3421_v62 = vpop.f32.mrf.mxu1 }
 0x32f   : > { %v5894_v4 = vmul.f32 %v3853_v38, %v3841_v58  ;;  %v3422_v34 = vadd.f32 %v3421_v62, %v3379_v32  ;;  %v5896_v63 = vpop.f32.mrf.mxu2  ;;  %v3383_v10 = vadd.f32 %v3382_v6, %v3332_v53  ;;  %v4116_v33 = vpop.eup %4115 }
 0x330   : > { %vm3870_vm2 = vweird.f32 %v4116_v33 }
 0x331   : > { %v3794_v21 = vsub.f32 %v3422_v34, %v5709_v11  ;;  %v3843_v11 = vadd.f32 6.5025, %v5752_v3  ;;  %v3844_v3 = vadd.f32 6.5025, %v5781_v52  ;;  %4117 = vrcp.f32 %v5894_v4  ;;  %vm3871_vm4 = vmor %vm3869_vm3, %vm3870_vm2 }
 0x332   : > { %vm3883_vm7 = vweird.f32 %v5894_v4 }
 0x333   : > { %v3848_v8 = vadd.f32 %v3794_v21, %v3788_v14  ;;  %v3804_v21 = vmul.f32 2.0, %v5650_v51 }
 0x335   : > { %v3854_v45 = vadd.f32 58.5225, %v3848_v8  ;;  %v5903_v29 = vpop.f32.mrf.mxu3 }
 0x336   : > { %v3386_v56 = vpop.f32.mrf.mxu0  ;;  %v3425_v12 = vpop.f32.mrf.mxu1 }
 0x337   : > { %v5905_v40 = vmul.f32 %v3854_v45, %v3842_v57  ;;  %v3426_v0 = vadd.f32 %v3425_v12, %v3383_v10  ;;  %v5907_v27 = vpop.f32.mrf.mxu2  ;;  %v3387_v7 = vadd.f32 %v3386_v56, %v3338_v23  ;;  %v5940_v32 = vpop.eup %4117  ;;  %v3875_v12 = vand.u32 2147483648, %v5883_v22 }
 0x338   : > { %v3879_v48 = vmul.f32 %v5940_v32, %v5894_v4  ;;  %vm3884_vm6 = vweird.f32 %v5940_v32 }
 0x339   : > { %v3795_v49 = vsub.f32 %v3426_v0, %v5741_v2  ;;  %4119 = vrcp.f32 %v5905_v40  ;;  %vm3885_vm8 = vmor %vm3883_vm7, %vm3884_vm6  ;;  %vm3897_vm11 = vweird.f32 %v5905_v40 }
 0x33a   : > { %v3880_v8 = vsub.f32 1.0, %v3879_v48 }
 0x33b   : > { %v3849_v44 = vadd.f32 %v3795_v49, %v3789_v42 }
 0x33d   : > { %v3855_v20 = vadd.f32 58.5225, %v3849_v44  ;;  %v5914_v14 = vpop.f32.mrf.mxu3 }
 0x33e   : > { %v3390_v53 = vpop.f32.mrf.mxu0  ;;  %v3429_v30 = vpop.f32.mrf.mxu1 }
 0x33f   : > { %v5916_v50 = vmul.f32 %v3855_v20, %v3843_v11  ;;  %v3430_v55 = vadd.f32 %v3429_v30, %v3387_v7  ;;  %v5918_v60 = vpop.f32.mrf.mxu2  ;;  %v3391_v61 = vadd.f32 %v3390_v53, %v3344_v17  ;;  %v3873_v11 = vand.u32 2147483647, %v5883_v22 }
 0x340   : > { %v3810_v53 = vadd.f32 6.5025, %v3804_v21 }
 0x341   : > { %v3796_v2 = vsub.f32 %v3430_v55, %v5771_v26  ;;  %v3865_v26 = vmul.f32 %v4116_v33, %v5883_v22  ;;  %4121 = vrcp.f32 %v5916_v50  ;;  %vm3874_vm5 = vcmp.eq.f32.partialorder %v3873_v11, 8.507059e+37 }
 0x342   : > { %vm3911_vm15 = vweird.f32 %v5916_v50 }
 0x343   : > { %v3850_v1 = vadd.f32 %v3796_v2, %v3790_v9  ;;  %v3866_v9 = vsub.f32 1.0, %v3865_v26  ;;  %v3881_v2 = vmul.f32 %v5940_v32, %v3880_v8  ;;  %v3806_v8 = vmul.f32 2.0, %v5712_v16 }
 0x345   : > { %v3856_v42 = vadd.f32 58.5225, %v3850_v1  ;;  %v5926_v23 = vpop.f32.mrf.mxu3  ;;  %v3867_v25 = vmul.f32 %v4116_v33, %v3866_v9  ;;  %v3876_v1 = vor.u32 1.1754944e-38, %v3875_v12 }
 0x346   : > { %v3433_v28 = vpop.f32.mrf.mxu1  ;;  %v3595_v41 = vpop.f32.mrf.mxu0 }
 0x347   : > { %v5928_v37 = vmul.f32 %v3856_v42, %v3844_v3  ;;  %v3434_v54 = vadd.f32 %v3433_v28, %v3391_v61  ;;  %v5930_v39 = vpop.f32.mrf.mxu2  ;;  %v3596_v31 = vadd.f32 %v3595_v41, %v5876_v19  ;;  %v5948_v19 = vpop.eup %4119  ;;  %v3868_v45 = vadd.f32 %v4116_v33, %v3867_v25 }
 0x348   : > { %v3893_v30 = vmul.f32 %v5948_v19, %v5905_v40  ;;  %v3558_v3 = vadd.f32 %v5892_v5, %v5896_v63  ;;  %v3805_v42 = vmul.f32 2.0, %v5681_v43  ;;  %v3889_v5 = vand.u32 2147483648, %v5894_v4 }
 0x349   : > { %v3797_v18 = vsub.f32 %v3434_v54, %v5797_v35  ;;  %4123 = vrcp.f32 %v5928_v37  ;;  %vm3898_vm10 = vweird.f32 %v5948_v19 }
 0x34a   : > { %v3894_v28 = vsub.f32 1.0, %v3893_v30  ;;  %v3890_v25 = vor.u32 1.1754944e-38, %v3889_v5  ;;  %vm3899_vm12 = vmor %vm3897_vm11, %vm3898_vm10 }
 0x34b   : > { %v3851_v52 = vadd.f32 %v3797_v18, %v3791_v46  ;;  %v3882_v18 = vadd.f32 %v5940_v32, %v3881_v2 }
 0x34d   : > { %v3857_v17 = vadd.f32 58.5225, %v3851_v52  ;;  %v3745_v58 = vpop.f32.mrf.mxu3 }
 0x34e   : > { %v3600_v38 = vpop.f32.mrf.mxu0  ;;  %v3645_v6 = vpop.f32.mrf.mxu1 }
 0x34f   : > { %v5943_v62 = vmul.f32 %v3857_v17, %v3845_v47  ;;  %v3646_v35 = vadd.f32 %v3645_v6, %v3596_v31  ;;  %v3702_v34 = vpop.f32.mrf.mxu2  ;;  %v3601_v57 = vadd.f32 %v3600_v38, %v5885_v59  ;;  %v3872_v59 = vsel %vm3871_vm4, %v4116_v33, %v3868_v45  ;;  %v5966_v47 = vpop.eup %4121 }
 0x350   : > { %v3877_v41 = vsel %vm3874_vm5, %v3876_v1, %v3872_v59  ;;  %v3887_v31 = vand.u32 2147483647, %v5894_v4  ;;  %v3811_v6 = vadd.f32 6.5025, %v3805_v42  ;;  %v5983_v45 = vpop.eup %4123  ;;  %vm3912_vm14 = vweird.f32 %v5966_v47 }
 0x351   : > { %v3703_v24 = vadd.f32 %v3702_v34, %v3646_v35  ;;  %v3886_v34 = vsel %vm3885_vm8, %v5940_v32, %v3882_v18  ;;  %4125 = vrcp.f32 %v5943_v62  ;;  %v3921_v59 = vmul.f32 %v5983_v45, %v5928_v37  ;;  %vm3913_vm0 = vmor %vm3911_vm15, %vm3912_vm14 }
 0x352   : > { %vm3888_vm9 = vcmp.eq.f32.partialorder %v3887_v31, 8.507059e+37  ;;  %v3915_v31 = vand.u32 2147483647, %v5916_v50  ;;  %vm3926_vm3 = vweird.f32 %v5983_v45  ;;  %vm3925_vm4 = vweird.f32 %v5928_v37 }
 0x353   : > { %v3746_v46 = vadd.f32 %v3745_v58, %v3703_v24  ;;  %v3907_v24 = vmul.f32 %v5966_v47, %v5916_v50  ;;  %vm3927_vm5 = vmor %vm3925_vm4, %vm3926_vm3  ;;  %vm3939_vm8 = vweird.f32 %v5943_v62 }
 0x354   : > { %vm3916_vm2 = vcmp.eq.f32.partialorder %v3915_v31, 8.507059e+37 }
 0x355   : > { %v3798_v10 = vsub.f32 %v3746_v46, %v5650_v51  ;;  %v3749_v56 = vpop.f32.mrf.mxu3  ;;  %v3562_v46 = vadd.f32 %v5903_v29, %v5907_v27  ;;  %v3901_v29 = vand.u32 2147483647, %v5905_v40  ;;  %v3903_v27 = vand.u32 2147483648, %v5905_v40 }
 0x356   : > { %v3605_v0 = vpop.f32.mrf.mxu0  ;;  %v3651_v49 = vpop.f32.mrf.mxu1 }
 0x357   : > { %v3816_v44 = vmul.f32 2.0, %v3798_v10  ;;  %v3652_v7 = vadd.f32 %v3651_v49, %v3601_v57  ;;  %v3706_v20 = vpop.f32.mrf.mxu2  ;;  %v3606_v26 = vadd.f32 %v3605_v0, %v3558_v3  ;;  %v3891_v57 = vsel %vm3888_vm9, %v3890_v25, %v3886_v34  ;;  %v6004_v5 = vpop.eup %4125 }
 0x358   : > { %v3908_v0 = vsub.f32 1.0, %v3907_v24  ;;  %vm3902_vm13 = vcmp.eq.f32.partialorder %v3901_v29, 8.507059e+37  ;;  %v3935_v24 = vmul.f32 %v6004_v5, %v5943_v62  ;;  %vm3940_vm7 = vweird.f32 %v6004_v5 }
 0x359   : > { %v3822_v51 = vadd.f32 58.5225, %v3816_v44  ;;  %v3707_v55 = vadd.f32 %v3706_v20, %v3652_v7  ;;  %vm3941_vm9 = vmor %vm3939_vm8, %vm3940_vm7 }
 0x35a   : > { %v3909_v3 = vmul.f32 %v5966_v47, %v3908_v0 }
 0x35b   : > { %v3828_v22 = vmul.f32 %v3822_v51, %v3810_v53  ;;  %v3750_v61 = vadd.f32 %v3749_v56, %v3707_v55  ;;  %v3812_v51 = vadd.f32 6.5025, %v3806_v8  ;;  %v3808_v8 = vmul.f32 2.0, %v5774_v13 }
 0x35d   : > { %v3948_v54 = vmul.f32 %v3877_v41, %v3828_v22  ;;  %v3799_v33 = vsub.f32 %v3750_v61, %v5681_v43  ;;  %v3753_v52 = vpop.f32.mrf.mxu3  ;;  %v3895_v43 = vmul.f32 %v5948_v19, %v3894_v28  ;;  %v3904_v22 = vor.u32 1.1754944e-38, %v3903_v27 }
 0x35e   : > { %v3610_v63 = vpop.f32.mrf.mxu0  ;;  %v3657_v9 = vpop.f32.mrf.mxu1  ;;  %v3566_v61 = vadd.f32 %v5914_v14, %v5918_v60  ;;  %v3807_v41 = vmul.f32 2.0, %v5744_v36  ;;  %v3917_v14 = vand.u32 2147483648, %v5916_v50  ;;  %v3570_v50 = vadd.f32 %v5926_v23, %v5930_v39 }
 0x35f   : > { %v3817_v17 = vmul.f32 2.0, %v3799_v33  ;;  %v3658_v58 = vadd.f32 %v3657_v9, %v3606_v26  ;;  %v3710_v38 = vpop.f32.mrf.mxu2  ;;  %v3896_v10 = vadd.f32 %v5948_v19, %v3895_v43  ;;  %v3611_v56 = vadd.f32 %v3610_v63, %v3562_v46 }
 0x360   : > { %v3954_v53 = vsel %vm2107_vm1, %v3948_v54, 0.0  ;;  %v3922_v26 = vsub.f32 1.0, %v3921_v59  ;;  %v3918_v46 = vor.u32 1.1754944e-38, %v3917_v14  ;;  %v3931_v23 = vand.u32 2147483648, %v5928_v37 }
 0x361   : > { %v3823_v35 = vadd.f32 58.5225, %v3817_v17  ;;  %v3711_v48 = vadd.f32 %v3710_v38, %v3658_v58  ;;  %v3900_v1 = vsel %vm3899_vm12, %v5948_v19, %v3896_v10  ;;  %v3910_v19 = vadd.f32 %v5966_v47, %v3909_v3 }
 0x362   : > { %v3905_v54 = vsel %vm3902_vm13, %v3904_v22, %v3900_v1  ;;  %v3813_v38 = vadd.f32 6.5025, %v3807_v41  ;;  %v3814_v27 = vadd.f32 6.5025, %v3808_v8  ;;  %v3945_v22 = vand.u32 2147483648, %v5943_v62 }
 0x363   : > { %v3829_v4 = vmul.f32 %v3823_v35, %v3811_v6  ;;  %v3754_v21 = vadd.f32 %v3753_v52, %v3711_v48  ;;  %v3914_v48 = vsel %vm3913_vm0, %v5966_v47, %v3910_v19 }
 0x365   : > { %v3949_v32 = vmul.f32 %v3891_v57, %v3829_v4  ;;  %v3800_v12 = vsub.f32 %v3754_v21, %v5712_v16  ;;  %v3757_v49 = vpop.f32.mrf.mxu3  ;;  %v3919_v57 = vsel %vm3916_vm2, %v3918_v46, %v3914_v48 }
 0x366   : > { %v3663_v44 = vpop.f32.mrf.mxu1  ;;  %v3615_v16 = vpop.f32.mrf.mxu0 }
 0x367   : > { %v3818_v11 = vmul.f32 2.0, %v3800_v12  ;;  %v3664_v7 = vadd.f32 %v3663_v44, %v3611_v56  ;;  %v3714_v20 = vpop.f32.mrf.mxu2  ;;  %v3955_v30 = vsel %vm2107_vm1, %v3949_v32, 0.0  ;;  %v3616_v33 = vadd.f32 %v3615_v16, %v3566_v61 }
 0x368   : > { %v3956_v55 = vadd.f32 %v3955_v30, %v3954_v53  ;;  %v3936_v56 = vsub.f32 1.0, %v3935_v24  ;;  %v3929_v44 = vand.u32 2147483647, %v5928_v37  ;;  %v3932_v16 = vor.u32 1.1754944e-38, %v3931_v23 }
 0x369   : > { %v3824_v2 = vadd.f32 58.5225, %v3818_v11  ;;  %v3715_v40 = vadd.f32 %v3714_v20, %v3664_v7  ;;  %v3943_v61 = vand.u32 2147483647, %v5943_v62 }
 0x36a   : > { %v3937_v30 = vmul.f32 %v6004_v5, %v3936_v56  ;;  %vm3930_vm6 = vcmp.eq.f32.partialorder %v3929_v44, 8.507059e+37 }
 0x36b   : > { %v3830_v42 = vmul.f32 %v3824_v2, %v3812_v51  ;;  %v3758_v28 = vadd.f32 %v3757_v49, %v3715_v40  ;;  %v3809_v2 = vmul.f32 2.0, %v5800_v15  ;;  %vm3944_vm10 = vcmp.eq.f32.partialorder %v3943_v61, 8.507059e+37 }
 0x36c   : > { %v3938_v1 = vadd.f32 %v6004_v5, %v3937_v30 }
 0x36d   : > { %v3801_v18 = vsub.f32 %v3758_v28, %v5744_v36  ;;  %v3950_v52 = vmul.f32 %v3905_v54, %v3830_v42  ;;  %v3761_v6 = vpop.f32.mrf.mxu3  ;;  %v3923_v36 = vmul.f32 %v5983_v45, %v3922_v26  ;;  %v3815_v41 = vadd.f32 6.5025, %v3809_v2 }
 0x36e   : > { %v3669_v63 = vpop.f32.mrf.mxu1  ;;  %v3620_v25 = vpop.f32.mrf.mxu0  ;;  %v3946_v26 = vor.u32 1.1754944e-38, %v3945_v22 }
 0x36f   : > { %v3819_v60 = vmul.f32 2.0, %v3801_v18  ;;  %v3670_v9 = vadd.f32 %v3669_v63, %v3616_v33  ;;  %v3718_v17 = vpop.f32.mrf.mxu2  ;;  %v3957_v58 = vsel %vm2107_vm1, %v3950_v52, 0.0  ;;  %v3924_v10 = vadd.f32 %v5983_v45, %v3923_v36 }
 0x370   : > { %v3958_v43 = vadd.f32 %v3957_v58, %v3956_v55  ;;  %v3621_v32 = vadd.f32 %v3620_v25, %v3570_v50 }
 0x371   : > { %v3825_v35 = vadd.f32 58.5225, %v3819_v60  ;;  %v3719_v34 = vadd.f32 %v3718_v17, %v3670_v9 }
 0x373   : > { %v3831_v4 = vmul.f32 %v3825_v35, %v3813_v38  ;;  %v3762_v21 = vadd.f32 %v3761_v6, %v3719_v34 }
 0x375   : > { %v3802_v47 = vsub.f32 %v3762_v21, %v5774_v13  ;;  %v3951_v12 = vmul.f32 %v3919_v57, %v3831_v4  ;;  %v3928_v13 = vsel %vm3927_vm5, %v5983_v45, %v3924_v10  ;;  %v3765_v51 = vpop.f32.mrf.mxu3 }
 0x376   : > { %v3675_v0 = vpop.f32.mrf.mxu1  ;;  %v3933_v37 = vsel %vm3930_vm6, %v3932_v16, %v3928_v13 }
 0x377   : > { %v3820_v39 = vmul.f32 2.0, %v3802_v47  ;;  %v3676_v49 = vadd.f32 %v3675_v0, %v3621_v32  ;;  %v3959_v29 = vsel %vm2107_vm1, %v3951_v12, 0.0  ;;  %v3722_v11 = vpop.f32.mrf.mxu2 }
 0x378   : > { %v3960_v7 = vadd.f32 %v3959_v29, %v3958_v43 }
 0x379   : > { %v3826_v20 = vadd.f32 58.5225, %v3820_v39  ;;  %v3723_v53 = vadd.f32 %v3722_v11, %v3676_v49 }
 0x37b   : > { %v3766_v59 = vadd.f32 %v3765_v51, %v3723_v53  ;;  %v3832_v55 = vmul.f32 %v3826_v20, %v3814_v27 }
 0x37d   : > { %v3803_v40 = vsub.f32 %v3766_v59, %v5800_v15  ;;  %v3952_v3 = vmul.f32 %v3933_v37, %v3832_v55  ;;  %v3942_v15 = vsel %vm3941_vm9, %v6004_v5, %v3938_v1 }
 0x37e   : > { %v3947_v18 = vsel %vm3944_vm10, %v3946_v26, %v3942_v15 }
 0x37f   : > { %v3821_v45 = vmul.f32 2.0, %v3803_v40  ;;  %v3961_v42 = vsel %vm2107_vm1, %v3952_v3, 0.0 }
 0x380   : > { %v3962_v28 = vadd.f32 %v3961_v42, %v3960_v7 }
 0x381   : > { %v3827_v54 = vadd.f32 58.5225, %v3821_v45 }
 0x383   : > { %v3833_v33 = vmul.f32 %v3827_v54, %v3815_v41 }
 0x385   : > { %v3953_v19 = vmul.f32 %v3947_v18, %v3833_v33 }
 0x387   : > { %v3963_v52 = vsel %vm2107_vm1, %v3953_v19, 0.0 }
 0x388   : > { %v3964_v63 = vadd.f32 %v3963_v52, %v3962_v28 }
 0x38a   : > { %3965 = vadd.xlane.f32.xlu0 %v3964_v63 }
 0x3fd   : > { %v3966_v62 = vpop.xlane.xlu0 %3965 }
 0x3fe   : > { %v3967_v14 = vrot.slane %v3966_v62, 4 }
 0x400   : > { %v3968_v60 = vadd.f32 %v3967_v14, %v3966_v62 }
 0x402   : > { %v3969_v9 = vrot.slane %v3968_v60, 2 }
 0x404   : > { %v3970_v17 = vadd.f32 %v3969_v9, %v3968_v60 }
 0x406   : > { %v3971_v31 = vrot.slane %v3970_v17, 1 }
 0x408   : > { %v3972_v58 = vadd.f32 %v3971_v31, %v3970_v17 }
 0x40a   : > { %4074 = vpush %v3972_v58 }
 0x43b   : > { %s4075_s23 = spop %4074 }
 0x43c   : > { %v3974_v5 = vstv %s4075_s23 }
 0x43d   : > { %3975 = vst [vmem:[%s207_s14] sm:$0xff] %v3974_v5 }
 0x43e   : > { %4159 = shalt.err (!%p4156_p3)
}
 0x43f   : > { %4076 = dma.vmem_to_hbm [thread:$0]  (%p4259_p5), %s3990_s20, 128, %s3992_s22, %s3977_s27  }
 0x440 PF: > { %p4082_p4 = scmp.ge.s32.totalorder %s4194_s18, 2  ;;  %s4003_s8 = sand.u32 1, %s4182_s15  }
 0x441   : > { %s4004_s9 = scalar_lea.sflag [#allocation3], %s4003_s8 }
 0x442   : > { %p4079_p7 = pnand %p4082_p4, %p4263_p6 }
 0x444   : > { %p4080_p8 = pneg %p4079_p7 }
 0x446   : > { %4177 = dma.done.wait (%p4080_p8), %s4004_s9, 128  }
 0x447   : > { %4179 = vsyncadd (%p4080_p8), %s4004_s9, 4294967168  ;;  %p14_p9 = scmp.ge.s32.totalorder %s4246_s21, 4   ;;  %s6133_s15 = smov %s4186_s16 }
 0x448   : > { %s6134_s16 = smov %s4190_s17  ;;  %s6135_s17 = smov %s4257_s24 }
 0x449   : > { %s6136_s18 = smov %s4246_s21  ;;  %16 = sbr.rel (!%p14_p9) target bundleno = 3 (0x3), region = 74 }
 0x44e   :  { %4010 = vsyncpa [#allocation3], 1 }
 0x44f   :  { %4012 = vsyncpa [#allocation3 + $0x1], 1 }

</bundles_post_ra>
